<compile_context>
chip_gen: v7x
topology: tpu7x:2x2x1
jax: 0.10.0
libtpu: 0.0.40
codegen_flags: <defaults>
</compile_context>

<pallas_src>
import functools

import jax
import jax.numpy as jnp
from jax.experimental import pallas as pl
from jax.experimental.pallas import tpu as pltpu


_LANE = 128
_MXU_K = 256           # contraction-dim alignment for v6e/v7x 2x256^2 MXUs
_NEG_INF = -1e30       # effectively -inf bias for padded logit lanes (exp -> 0)


def _round_up(a, b):
    return (a + b - 1) // b * b


def _mos_kernel(x_ref, wg_ref, bg_ref, wc_ref, bc_ref, o_ref, *, num_mixtures, c_pad):
    # x_ref : (tile_n, d_pad)       bf16 input tile
    # wg_ref: (d_pad, gate_pad)     bf16 gating weights (zero-padded cols)
    # bg_ref: (1, gate_pad)         f32 gating bias (padded lanes = -1e30)
    # wc_ref: (d_pad, K*c_pad)      bf16 class weights, one 128-aligned block per head
    # bc_ref: (1, K*c_pad)          f32 class biases (padded lanes = -1e30)
    # o_ref : (tile_n, c_pad)       lane-dense output slab
    x = x_ref[...]

    # Gating softmax; padded lanes carry -1e30 bias -> probability exactly 0.
    g_logits = jnp.dot(x, wg_ref[...], preferred_element_type=jnp.float32) + bg_ref[...]
    g_max = jnp.max(g_logits, axis=-1, keepdims=True)
    g_e = jnp.exp(g_logits - g_max)
    gate = g_e * pl.reciprocal(jnp.sum(g_e, axis=-1, keepdims=True), approx=True)

    acc = None
    for k in range(num_mixtures):                      # K is small & static
        lo = k * c_pad                                 # 128-aligned static slice
        logits_k = (jnp.dot(x, wc_ref[:, lo:lo + c_pad],
                            preferred_element_type=jnp.float32)
                    + bc_ref[:, lo:lo + c_pad])
        m_k = jnp.max(logits_k, axis=-1, keepdims=True)
        e_k = jnp.exp(logits_k - m_k)
        # Fuse 1/denom with the gate weight: a single per-row scalar, then one
        # full-width multiply per mixture.
        scale_k = gate[:, k:k + 1] * pl.reciprocal(
            jnp.sum(e_k, axis=-1, keepdims=True), approx=True)
        term = e_k * scale_k
        acc = term if acc is None else acc + term
    o_ref[...] = acc.astype(o_ref.dtype)


def mixture_of_softmaxes(x, w_mix, b_mix, w_soft, b_soft, *, tile_n=None):
    """x: (N, D); w_mix: (D, K); b_mix: (K,); w_soft: (K, D, C); b_soft: (K, C)."""
    n, d = x.shape
    k, d2, c = w_soft.shape
    assert d2 == d and w_mix.shape == (d, k)
    assert b_mix.shape == (k,) and b_soft.shape == (k, c)

    out_dtype = x.dtype
    out_bytes = jnp.dtype(out_dtype).itemsize

    c_pad = _round_up(c, _LANE)
    gate_pad = _round_up(max(k, 1), _LANE)
    kcp = k * c_pad
    d_pad = _round_up(d, _MXU_K)

    f32, bf16 = jnp.float32, jnp.bfloat16

    # bf16 weight slabs, zero-padded along D and along classes; padded class /
    # gate lanes get a -1e30 f32 bias so their softmax probability is 0.
    w_gate = jnp.pad(w_mix.astype(bf16), ((0, d_pad - d), (0, gate_pad - k)))
    b_gate = jnp.pad(b_mix.astype(f32), (0, gate_pad - k),
                     constant_values=_NEG_INF).reshape(1, gate_pad)

    w_cls = jnp.pad(w_soft.astype(bf16), ((0, 0), (0, d_pad - d), (0, c_pad - c)))
    w_cls = jnp.transpose(w_cls, (1, 0, 2)).reshape(d_pad, kcp)
    b_cls = jnp.pad(b_soft.astype(f32), ((0, 0), (0, c_pad - c)),
                    constant_values=_NEG_INF).reshape(1, kcp)

    # Chip-aware VMEM cap: v5e/v6e have 128 MiB physical, v7x 64 MiB per TC.
    try:
        vmem_phys = int(pltpu.get_tpu_info().vmem_capacity_bytes)
    except Exception:
        vmem_phys = 64 << 20
    vmem_cap = (100 << 20) if vmem_phys >= (128 << 20) else (48 << 20)

    # Resident (constant index_map) weight/bias bytes; budgeted x2 in case the
    # single-buffered spec path is unavailable and they end up double-buffered.
    resident = 2 * (d_pad * (gate_pad + kcp) * 2 + (gate_pad + kcp) * 4)
    # Per batch-row bytes: double-buffered bf16 x tile + double-buffered output
    # tile + in-kernel f32 temporaries (~4*c_pad for logits/e/acc, gate_pad gate).
    per_row = 2 * d_pad * 2 + 2 * c_pad * out_bytes + (4 * c_pad + gate_pad) * 4

    if tile_n is None:
        tile_n = (int(0.8 * vmem_cap) - resident) // max(per_row, 1)
        tile_n = max(8, min(1024, (tile_n // 8) * 8))
        # Keep >= 2 grid steps when possible so both v7x TensorCores get work.
        if n > 8:
            tile_n = min(tile_n, max(8, _round_up((n + 1) // 2, 8)))
    tile_n = max(8, _round_up(min(int(tile_n), _round_up(n, 8)), 8))

    n_pad = _round_up(n, tile_n)
    x_p = jnp.pad(x, ((0, n_pad - n), (0, d_pad - d))).astype(bf16)
    grid = (n_pad // tile_n,)

    budget = resident + tile_n * per_row
    vmem_limit = int(min(vmem_cap, max(16 << 20, int(1.3 * budget))))

    kernel = functools.partial(_mos_kernel, num_mixtures=k, c_pad=c_pad)

    def build(single_buffer_weights):
        if single_buffer_weights:
            def const_spec(shape):
                return pl.BlockSpec(shape, lambda i: (0, 0),
                                    pipeline_mode=pl.Buffered(1))
        else:
            def const_spec(shape):
                return pl.BlockSpec(shape, lambda i: (0, 0))
        return pl.pallas_call(
            kernel,
            out_shape=jax.ShapeDtypeStruct((n_pad, c_pad), out_dtype),
            grid=grid,
            in_specs=[
                pl.BlockSpec((tile_n, d_pad), lambda i: (i, 0)),
                const_spec((d_pad, gate_pad)),   # VMEM-resident gate weights
                const_spec((1, gate_pad)),       # gate bias (f32)
                const_spec((d_pad, kcp)),        # VMEM-resident class weights
                const_spec((1, kcp)),            # class biases (f32)
            ],
            out_specs=pl.BlockSpec((tile_n, c_pad), lambda i: (i, 0)),
            compiler_params=pltpu.CompilerParams(
                dimension_semantics=("parallel",),
                vmem_limit_bytes=vmem_limit,
            ),
        )

    args = (x_p, w_gate, b_gate, w_cls, b_cls)
    try:
        out_padded = build(True)(*args)
    except Exception:
        # Fallback if single-buffered constant specs are rejected by this JAX build.
        out_padded = build(False)(*args)
    return out_padded[:n, :c]


def mixture_of_softmaxes_ref(x, w_mix, b_mix, w_soft, b_soft):
    """Pure-JAX f32 reference matching the PyTorch module semantics exactly."""
    mix = jax.nn.softmax(x @ w_mix + b_mix, axis=1)                        # (N, K)
    logits = jnp.einsum("nd,kdc->nkc", x, w_soft) + b_soft[None, :, :]     # (N, K, C)
    probs = jax.nn.softmax(logits, axis=2)                                 # softmax over classes
    return jnp.sum(probs * mix[:, :, None], axis=1)                        # (N, C)


if __name__ == "__main__":
    # Small deterministic problem: input (N, input_size) -> output (N, num_classes).
    N, D, K, C = 48, 32, 4, 16  # batch, input_size, num_mixtures, num_classes

    key = jax.random.PRNGKey(0)
    kx, kwm, kbm, kws, kbs = jax.random.split(key, 5)

    x = jax.random.normal(kx, (N, D), dtype=jnp.float32)
    w_mix = jax.random.normal(kwm, (D, K), dtype=jnp.float32) * 0.1
    b_mix = jax.random.normal(kbm, (K,), dtype=jnp.float32) * 0.1
    w_soft = jax.random.normal(kws, (K, D, C), dtype=jnp.float32) * 0.1
    b_soft = jax.random.normal(kbs, (K, C), dtype=jnp.float32) * 0.1

    # tile_n=16 -> a 3-step grid, exercising the pipelined batch tiling.
    out = mixture_of_softmaxes(x, w_mix, b_mix, w_soft, b_soft, tile_n=16)
    out = jax.block_until_ready(out)

    ref = mixture_of_softmaxes_ref(x, w_mix, b_mix, w_soft, b_soft)
    assert out.shape == (N, C), out.shape
    # bf16 MXU feed + approx EUP reciprocal -> slightly looser tolerance vs f32 ref.
    err = float(jnp.max(jnp.abs(out - ref)))
    assert jnp.allclose(out, ref, atol=2e-2, rtol=2e-2), err
    # Each output row is a convex combination of softmaxes -> sums to ~1.
    assert jnp.allclose(jnp.sum(out, axis=1), 1.0, atol=1e-2)

    print("KERNEL_OK")
</pallas_src>

<mosaic_0001>
module attributes {stable_mosaic.version = 11 : i64} {
  func.func @_mos_kernel(%arg0: i32, %arg1: memref<16x256xbf16, #tpu.memory_space<vmem>>, %arg2: memref<256x128xbf16, #tpu.memory_space<vmem>>, %arg3: memref<1x128xf32, #tpu.memory_space<vmem>>, %arg4: memref<256x512xbf16, #tpu.memory_space<vmem>>, %arg5: memref<1x512xf32, #tpu.memory_space<vmem>>, %arg6: memref<16x128xf32, #tpu.memory_space<vmem>>) attributes {dimension_semantics = [#tpu.dimension_semantics<parallel>], iteration_bounds = array<i64: 3>, scalar_prefetch = 0 : i64, scratch_operands = 0 : i64, tpu.core_type = #tpu.core_type<tc>, window_params = [{transform_indices = @transform_0, window_bounds = array<i64: 16, 256>}, {pipeline_mode = #tpu.pipeline_mode<synchronous>, transform_indices = @transform_1, window_bounds = array<i64: 256, 128>}, {pipeline_mode = #tpu.pipeline_mode<synchronous>, transform_indices = @transform_2, window_bounds = array<i64: 1, 128>}, {pipeline_mode = #tpu.pipeline_mode<synchronous>, transform_indices = @transform_3, window_bounds = array<i64: 256, 512>}, {pipeline_mode = #tpu.pipeline_mode<synchronous>, transform_indices = @transform_4, window_bounds = array<i64: 1, 512>}, {transform_indices = @transform_5, window_bounds = array<i64: 16, 128>}]} {
    %c0 = arith.constant 0 : index
    %c0_0 = arith.constant 0 : index
    %0 = vector.load %arg1[%c0, %c0_0] : memref<16x256xbf16, #tpu.memory_space<vmem>>, vector<16x256xbf16>
    %c0_1 = arith.constant 0 : index
    %c0_2 = arith.constant 0 : index
    %1 = vector.load %arg2[%c0_1, %c0_2] : memref<256x128xbf16, #tpu.memory_space<vmem>>, vector<256x128xbf16>
    %cst = arith.constant dense<0.000000e+00> : vector<16x128xf32>
    %2 = tpu.matmul %0, %1, %cst {dimension_numbers = #tpu.dot_dimension_numbers<[1], [0], [0], [1], [0, 0, 1, 1], [], []>} : vector<16x256xbf16>, vector<256x128xbf16>, vector<16x128xf32> -> vector<16x128xf32>
    %c0_3 = arith.constant 0 : index
    %c0_4 = arith.constant 0 : index
    %3 = vector.load %arg3[%c0_3, %c0_4] : memref<1x128xf32, #tpu.memory_space<vmem>>, vector<1x128xf32>
    %4 = vector.broadcast %3 : vector<1x128xf32> to vector<16x128xf32>
    %5 = arith.addf %2, %4 : vector<16x128xf32>
    %cst_5 = arith.constant dense<0xFF800000> : vector<16xf32>
    %6 = vector.multi_reduction <maximumf>, %5, %cst_5 [1] : vector<16x128xf32> to vector<16xf32>
    %7 = vector.shape_cast %6 : vector<16xf32> to vector<16x1xf32>
    %8 = vector.broadcast %7 : vector<16x1xf32> to vector<16x128xf32>
    %9 = arith.subf %5, %8 : vector<16x128xf32>
    %10 = math.exp %9 : vector<16x128xf32>
    %cst_6 = arith.constant dense<0.000000e+00> : vector<16xf32>
    %11 = vector.multi_reduction <add>, %10, %cst_6 [1] : vector<16x128xf32> to vector<16xf32>
    %12 = vector.shape_cast %11 : vector<16xf32> to vector<16x1xf32>
    %13 = tpu.reciprocal %12 {approx = true} : vector<16x1xf32> -> vector<16x1xf32>
    %14 = vector.broadcast %13 : vector<16x1xf32> to vector<16x128xf32>
    %15 = arith.mulf %10, %14 : vector<16x128xf32>
    %c0_7 = arith.constant 0 : index
    %c0_8 = arith.constant 0 : index
    %16 = vector.load %arg4[%c0_7, %c0_8] : memref<256x512xbf16, #tpu.memory_space<vmem>>, vector<256x128xbf16>
    %cst_9 = arith.constant dense<0.000000e+00> : vector<16x128xf32>
    %17 = tpu.matmul %0, %16, %cst_9 {dimension_numbers = #tpu.dot_dimension_numbers<[1], [0], [0], [1], [0, 0, 1, 1], [], []>} : vector<16x256xbf16>, vector<256x128xbf16>, vector<16x128xf32> -> vector<16x128xf32>
    %c0_10 = arith.constant 0 : index
    %c0_11 = arith.constant 0 : index
    %18 = vector.load %arg5[%c0_10, %c0_11] : memref<1x512xf32, #tpu.memory_space<vmem>>, vector<1x128xf32>
    %19 = vector.broadcast %18 : vector<1x128xf32> to vector<16x128xf32>
    %20 = arith.addf %17, %19 : vector<16x128xf32>
    %cst_12 = arith.constant dense<0xFF800000> : vector<16xf32>
    %21 = vector.multi_reduction <maximumf>, %20, %cst_12 [1] : vector<16x128xf32> to vector<16xf32>
    %22 = vector.shape_cast %21 : vector<16xf32> to vector<16x1xf32>
    %23 = vector.broadcast %22 : vector<16x1xf32> to vector<16x128xf32>
    %24 = arith.subf %20, %23 : vector<16x128xf32>
    %25 = math.exp %24 : vector<16x128xf32>
    %26 = vector.extract_strided_slice %15 {offsets = [0, 0], sizes = [16, 1], strides = [1, 1]} : vector<16x128xf32> to vector<16x1xf32>
    %cst_13 = arith.constant dense<0.000000e+00> : vector<16xf32>
    %27 = vector.multi_reduction <add>, %25, %cst_13 [1] : vector<16x128xf32> to vector<16xf32>
    %28 = vector.shape_cast %27 : vector<16xf32> to vector<16x1xf32>
    %29 = tpu.reciprocal %28 {approx = true} : vector<16x1xf32> -> vector<16x1xf32>
    %30 = arith.mulf %26, %29 : vector<16x1xf32>
    %31 = vector.broadcast %30 : vector<16x1xf32> to vector<16x128xf32>
    %32 = arith.mulf %25, %31 : vector<16x128xf32>
    %c0_14 = arith.constant 0 : index
    %c128 = arith.constant 128 : index
    %33 = vector.load %arg4[%c0_14, %c128] : memref<256x512xbf16, #tpu.memory_space<vmem>>, vector<256x128xbf16>
    %cst_15 = arith.constant dense<0.000000e+00> : vector<16x128xf32>
    %34 = tpu.matmul %0, %33, %cst_15 {dimension_numbers = #tpu.dot_dimension_numbers<[1], [0], [0], [1], [0, 0, 1, 1], [], []>} : vector<16x256xbf16>, vector<256x128xbf16>, vector<16x128xf32> -> vector<16x128xf32>
    %c0_16 = arith.constant 0 : index
    %c128_17 = arith.constant 128 : index
    %35 = vector.load %arg5[%c0_16, %c128_17] : memref<1x512xf32, #tpu.memory_space<vmem>>, vector<1x128xf32>
    %36 = vector.broadcast %35 : vector<1x128xf32> to vector<16x128xf32>
    %37 = arith.addf %34, %36 : vector<16x128xf32>
    %cst_18 = arith.constant dense<0xFF800000> : vector<16xf32>
    %38 = vector.multi_reduction <maximumf>, %37, %cst_18 [1] : vector<16x128xf32> to vector<16xf32>
    %39 = vector.shape_cast %38 : vector<16xf32> to vector<16x1xf32>
    %40 = vector.broadcast %39 : vector<16x1xf32> to vector<16x128xf32>
    %41 = arith.subf %37, %40 : vector<16x128xf32>
    %42 = math.exp %41 : vector<16x128xf32>
    %43 = vector.extract_strided_slice %15 {offsets = [0, 1], sizes = [16, 1], strides = [1, 1]} : vector<16x128xf32> to vector<16x1xf32>
    %cst_19 = arith.constant dense<0.000000e+00> : vector<16xf32>
    %44 = vector.multi_reduction <add>, %42, %cst_19 [1] : vector<16x128xf32> to vector<16xf32>
    %45 = vector.shape_cast %44 : vector<16xf32> to vector<16x1xf32>
    %46 = tpu.reciprocal %45 {approx = true} : vector<16x1xf32> -> vector<16x1xf32>
    %47 = arith.mulf %43, %46 : vector<16x1xf32>
    %48 = vector.broadcast %47 : vector<16x1xf32> to vector<16x128xf32>
    %49 = arith.mulf %42, %48 : vector<16x128xf32>
    %50 = arith.addf %32, %49 : vector<16x128xf32>
    %c0_20 = arith.constant 0 : index
    %c256 = arith.constant 256 : index
    %51 = vector.load %arg4[%c0_20, %c256] : memref<256x512xbf16, #tpu.memory_space<vmem>>, vector<256x128xbf16>
    %cst_21 = arith.constant dense<0.000000e+00> : vector<16x128xf32>
    %52 = tpu.matmul %0, %51, %cst_21 {dimension_numbers = #tpu.dot_dimension_numbers<[1], [0], [0], [1], [0, 0, 1, 1], [], []>} : vector<16x256xbf16>, vector<256x128xbf16>, vector<16x128xf32> -> vector<16x128xf32>
    %c0_22 = arith.constant 0 : index
    %c256_23 = arith.constant 256 : index
    %53 = vector.load %arg5[%c0_22, %c256_23] : memref<1x512xf32, #tpu.memory_space<vmem>>, vector<1x128xf32>
    %54 = vector.broadcast %53 : vector<1x128xf32> to vector<16x128xf32>
    %55 = arith.addf %52, %54 : vector<16x128xf32>
    %cst_24 = arith.constant dense<0xFF800000> : vector<16xf32>
    %56 = vector.multi_reduction <maximumf>, %55, %cst_24 [1] : vector<16x128xf32> to vector<16xf32>
    %57 = vector.shape_cast %56 : vector<16xf32> to vector<16x1xf32>
    %58 = vector.broadcast %57 : vector<16x1xf32> to vector<16x128xf32>
    %59 = arith.subf %55, %58 : vector<16x128xf32>
    %60 = math.exp %59 : vector<16x128xf32>
    %61 = vector.extract_strided_slice %15 {offsets = [0, 2], sizes = [16, 1], strides = [1, 1]} : vector<16x128xf32> to vector<16x1xf32>
    %cst_25 = arith.constant dense<0.000000e+00> : vector<16xf32>
    %62 = vector.multi_reduction <add>, %60, %cst_25 [1] : vector<16x128xf32> to vector<16xf32>
    %63 = vector.shape_cast %62 : vector<16xf32> to vector<16x1xf32>
    %64 = tpu.reciprocal %63 {approx = true} : vector<16x1xf32> -> vector<16x1xf32>
    %65 = arith.mulf %61, %64 : vector<16x1xf32>
    %66 = vector.broadcast %65 : vector<16x1xf32> to vector<16x128xf32>
    %67 = arith.mulf %60, %66 : vector<16x128xf32>
    %68 = arith.addf %50, %67 : vector<16x128xf32>
    %c0_26 = arith.constant 0 : index
    %c384 = arith.constant 384 : index
    %69 = vector.load %arg4[%c0_26, %c384] : memref<256x512xbf16, #tpu.memory_space<vmem>>, vector<256x128xbf16>
    %cst_27 = arith.constant dense<0.000000e+00> : vector<16x128xf32>
    %70 = tpu.matmul %0, %69, %cst_27 {dimension_numbers = #tpu.dot_dimension_numbers<[1], [0], [0], [1], [0, 0, 1, 1], [], []>} : vector<16x256xbf16>, vector<256x128xbf16>, vector<16x128xf32> -> vector<16x128xf32>
    %c0_28 = arith.constant 0 : index
    %c384_29 = arith.constant 384 : index
    %71 = vector.load %arg5[%c0_28, %c384_29] : memref<1x512xf32, #tpu.memory_space<vmem>>, vector<1x128xf32>
    %72 = vector.broadcast %71 : vector<1x128xf32> to vector<16x128xf32>
    %73 = arith.addf %70, %72 : vector<16x128xf32>
    %cst_30 = arith.constant dense<0xFF800000> : vector<16xf32>
    %74 = vector.multi_reduction <maximumf>, %73, %cst_30 [1] : vector<16x128xf32> to vector<16xf32>
    %75 = vector.shape_cast %74 : vector<16xf32> to vector<16x1xf32>
    %76 = vector.broadcast %75 : vector<16x1xf32> to vector<16x128xf32>
    %77 = arith.subf %73, %76 : vector<16x128xf32>
    %78 = math.exp %77 : vector<16x128xf32>
    %79 = vector.extract_strided_slice %15 {offsets = [0, 3], sizes = [16, 1], strides = [1, 1]} : vector<16x128xf32> to vector<16x1xf32>
    %cst_31 = arith.constant dense<0.000000e+00> : vector<16xf32>
    %80 = vector.multi_reduction <add>, %78, %cst_31 [1] : vector<16x128xf32> to vector<16xf32>
    %81 = vector.shape_cast %80 : vector<16xf32> to vector<16x1xf32>
    %82 = tpu.reciprocal %81 {approx = true} : vector<16x1xf32> -> vector<16x1xf32>
    %83 = arith.mulf %79, %82 : vector<16x1xf32>
    %84 = vector.broadcast %83 : vector<16x1xf32> to vector<16x128xf32>
    %85 = arith.mulf %78, %84 : vector<16x128xf32>
    %86 = arith.addf %68, %85 : vector<16x128xf32>
    %c0_32 = arith.constant 0 : index
    %c0_33 = arith.constant 0 : index
    %87 = vector.load %arg6[%c0_32, %c0_33] : memref<16x128xf32, #tpu.memory_space<vmem>>, vector<16x128xf32>
    tpu.vector_store %arg6[%c0_32, %c0_33], %86 {strides = array<i32>} : memref<16x128xf32, #tpu.memory_space<vmem>>, vector<16x128xf32>,
    return
  }
  func.func @transform_0(%arg0: i32) -> (i32, i32) {
    %c0_i32 = arith.constant 0 : i32
    %c0_i32_0 = arith.constant 0 : i32
    return %arg0, %c0_i32 : i32, i32
  }
  func.func @transform_1(%arg0: i32) -> (i32, i32) {
    %c0_i32 = arith.constant 0 : i32
    %c0_i32_0 = arith.constant 0 : i32
    %c0_i32_1 = arith.constant 0 : i32
    return %c0_i32, %c0_i32_0 : i32, i32
  }
  func.func @transform_2(%arg0: i32) -> (i32, i32) {
    %c0_i32 = arith.constant 0 : i32
    %c0_i32_0 = arith.constant 0 : i32
    %c0_i32_1 = arith.constant 0 : i32
    return %c0_i32, %c0_i32_0 : i32, i32
  }
  func.func @transform_3(%arg0: i32) -> (i32, i32) {
    %c0_i32 = arith.constant 0 : i32
    %c0_i32_0 = arith.constant 0 : i32
    %c0_i32_1 = arith.constant 0 : i32
    return %c0_i32, %c0_i32_0 : i32, i32
  }
  func.func @transform_4(%arg0: i32) -> (i32, i32) {
    %c0_i32 = arith.constant 0 : i32
    %c0_i32_0 = arith.constant 0 : i32
    %c0_i32_1 = arith.constant 0 : i32
    return %c0_i32, %c0_i32_0 : i32, i32
  }
  func.func @transform_5(%arg0: i32) -> (i32, i32) {
    %c0_i32 = arith.constant 0 : i32
    %c0_i32_0 = arith.constant 0 : i32
    return %arg0, %c0_i32 : i32, i32
  }
}

module attributes {stable_mosaic.version = 11 : i64} {
  func.func @_mos_kernel(%arg0: i32, %arg1: memref<16x256xbf16, #tpu.memory_space<vmem>>, %arg2: memref<256x128xbf16, #tpu.memory_space<vmem>>, %arg3: memref<1x128xf32, #tpu.memory_space<vmem>>, %arg4: memref<256x512xbf16, #tpu.memory_space<vmem>>, %arg5: memref<1x512xf32, #tpu.memory_space<vmem>>, %arg6: memref<16x128xf32, #tpu.memory_space<vmem>>) attributes {dimension_semantics = [#tpu.dimension_semantics<parallel>], iteration_bounds = array<i64: 3>, scalar_prefetch = 0 : i64, scratch_operands = 0 : i64, tpu.core_type = #tpu.core_type<tc>, window_params = [{transform_indices = @transform_0, window_bounds = array<i64: 16, 256>}, {pipeline_mode = #tpu.pipeline_mode<synchronous>, transform_indices = @transform_1, window_bounds = array<i64: 256, 128>}, {pipeline_mode = #tpu.pipeline_mode<synchronous>, transform_indices = @transform_2, window_bounds = array<i64: 1, 128>}, {pipeline_mode = #tpu.pipeline_mode<synchronous>, transform_indices = @transform_3, window_bounds = array<i64: 256, 512>}, {pipeline_mode = #tpu.pipeline_mode<synchronous>, transform_indices = @transform_4, window_bounds = array<i64: 1, 512>}, {transform_indices = @transform_5, window_bounds = array<i64: 16, 128>}]} {
    %c0 = arith.constant 0 : index
    %c0_0 = arith.constant 0 : index
    %0 = vector.load %arg1[%c0, %c0_0] : memref<16x256xbf16, #tpu.memory_space<vmem>>, vector<16x256xbf16>
    %c0_1 = arith.constant 0 : index
    %c0_2 = arith.constant 0 : index
    %1 = vector.load %arg2[%c0_1, %c0_2] : memref<256x128xbf16, #tpu.memory_space<vmem>>, vector<256x128xbf16>
    %cst = arith.constant dense<0.000000e+00> : vector<16x128xf32>
    %2 = tpu.matmul %0, %1, %cst {dimension_numbers = #tpu.dot_dimension_numbers<[1], [0], [0], [1], [0, 0, 1, 1], [], []>} : vector<16x256xbf16>, vector<256x128xbf16>, vector<16x128xf32> -> vector<16x128xf32>
    %c0_3 = arith.constant 0 : index
    %c0_4 = arith.constant 0 : index
    %3 = vector.load %arg3[%c0_3, %c0_4] : memref<1x128xf32, #tpu.memory_space<vmem>>, vector<1x128xf32>
    %4 = vector.broadcast %3 : vector<1x128xf32> to vector<16x128xf32>
    %5 = arith.addf %2, %4 : vector<16x128xf32>
    %cst_5 = arith.constant dense<0xFF800000> : vector<16xf32>
    %6 = vector.multi_reduction <maximumf>, %5, %cst_5 [1] : vector<16x128xf32> to vector<16xf32>
    %7 = vector.shape_cast %6 : vector<16xf32> to vector<16x1xf32>
    %8 = vector.broadcast %7 : vector<16x1xf32> to vector<16x128xf32>
    %9 = arith.subf %5, %8 : vector<16x128xf32>
    %10 = math.exp %9 : vector<16x128xf32>
    %cst_6 = arith.constant dense<0.000000e+00> : vector<16xf32>
    %11 = vector.multi_reduction <add>, %10, %cst_6 [1] : vector<16x128xf32> to vector<16xf32>
    %12 = vector.shape_cast %11 : vector<16xf32> to vector<16x1xf32>
    %13 = tpu.reciprocal %12 {approx = true} : vector<16x1xf32> -> vector<16x1xf32>
    %14 = vector.broadcast %13 : vector<16x1xf32> to vector<16x128xf32>
    %15 = arith.mulf %10, %14 : vector<16x128xf32>
    %c0_7 = arith.constant 0 : index
    %c0_8 = arith.constant 0 : index
    %16 = vector.load %arg4[%c0_7, %c0_8] : memref<256x512xbf16, #tpu.memory_space<vmem>>, vector<256x128xbf16>
    %cst_9 = arith.constant dense<0.000000e+00> : vector<16x128xf32>
    %17 = tpu.matmul %0, %16, %cst_9 {dimension_numbers = #tpu.dot_dimension_numbers<[1], [0], [0], [1], [0, 0, 1, 1], [], []>} : vector<16x256xbf16>, vector<256x128xbf16>, vector<16x128xf32> -> vector<16x128xf32>
    %c0_10 = arith.constant 0 : index
    %c0_11 = arith.constant 0 : index
    %18 = vector.load %arg5[%c0_10, %c0_11] : memref<1x512xf32, #tpu.memory_space<vmem>>, vector<1x128xf32>
    %19 = vector.broadcast %18 : vector<1x128xf32> to vector<16x128xf32>
    %20 = arith.addf %17, %19 : vector<16x128xf32>
    %cst_12 = arith.constant dense<0xFF800000> : vector<16xf32>
    %21 = vector.multi_reduction <maximumf>, %20, %cst_12 [1] : vector<16x128xf32> to vector<16xf32>
    %22 = vector.shape_cast %21 : vector<16xf32> to vector<16x1xf32>
    %23 = vector.broadcast %22 : vector<16x1xf32> to vector<16x128xf32>
    %24 = arith.subf %20, %23 : vector<16x128xf32>
    %25 = math.exp %24 : vector<16x128xf32>
    %26 = vector.extract_strided_slice %15 {offsets = [0, 0], sizes = [16, 1], strides = [1, 1]} : vector<16x128xf32> to vector<16x1xf32>
    %cst_13 = arith.constant dense<0.000000e+00> : vector<16xf32>
    %27 = vector.multi_reduction <add>, %25, %cst_13 [1] : vector<16x128xf32> to vector<16xf32>
    %28 = vector.shape_cast %27 : vector<16xf32> to vector<16x1xf32>
    %29 = tpu.reciprocal %28 {approx = true} : vector<16x1xf32> -> vector<16x1xf32>
    %30 = arith.mulf %26, %29 : vector<16x1xf32>
    %31 = vector.broadcast %30 : vector<16x1xf32> to vector<16x128xf32>
    %32 = arith.mulf %25, %31 : vector<16x128xf32>
    %c0_14 = arith.constant 0 : index
    %c128 = arith.constant 128 : index
    %33 = vector.load %arg4[%c0_14, %c128] : memref<256x512xbf16, #tpu.memory_space<vmem>>, vector<256x128xbf16>
    %cst_15 = arith.constant dense<0.000000e+00> : vector<16x128xf32>
    %34 = tpu.matmul %0, %33, %cst_15 {dimension_numbers = #tpu.dot_dimension_numbers<[1], [0], [0], [1], [0, 0, 1, 1], [], []>} : vector<16x256xbf16>, vector<256x128xbf16>, vector<16x128xf32> -> vector<16x128xf32>
    %c0_16 = arith.constant 0 : index
    %c128_17 = arith.constant 128 : index
    %35 = vector.load %arg5[%c0_16, %c128_17] : memref<1x512xf32, #tpu.memory_space<vmem>>, vector<1x128xf32>
    %36 = vector.broadcast %35 : vector<1x128xf32> to vector<16x128xf32>
    %37 = arith.addf %34, %36 : vector<16x128xf32>
    %cst_18 = arith.constant dense<0xFF800000> : vector<16xf32>
    %38 = vector.multi_reduction <maximumf>, %37, %cst_18 [1] : vector<16x128xf32> to vector<16xf32>
    %39 = vector.shape_cast %38 : vector<16xf32> to vector<16x1xf32>
    %40 = vector.broadcast %39 : vector<16x1xf32> to vector<16x128xf32>
    %41 = arith.subf %37, %40 : vector<16x128xf32>
    %42 = math.exp %41 : vector<16x128xf32>
    %43 = vector.extract_strided_slice %15 {offsets = [0, 1], sizes = [16, 1], strides = [1, 1]} : vector<16x128xf32> to vector<16x1xf32>
    %cst_19 = arith.constant dense<0.000000e+00> : vector<16xf32>
    %44 = vector.multi_reduction <add>, %42, %cst_19 [1] : vector<16x128xf32> to vector<16xf32>
    %45 = vector.shape_cast %44 : vector<16xf32> to vector<16x1xf32>
    %46 = tpu.reciprocal %45 {approx = true} : vector<16x1xf32> -> vector<16x1xf32>
    %47 = arith.mulf %43, %46 : vector<16x1xf32>
    %48 = vector.broadcast %47 : vector<16x1xf32> to vector<16x128xf32>
    %49 = arith.mulf %42, %48 : vector<16x128xf32>
    %50 = arith.addf %32, %49 : vector<16x128xf32>
    %c0_20 = arith.constant 0 : index
    %c256 = arith.constant 256 : index
    %51 = vector.load %arg4[%c0_20, %c256] : memref<256x512xbf16, #tpu.memory_space<vmem>>, vector<256x128xbf16>
    %cst_21 = arith.constant dense<0.000000e+00> : vector<16x128xf32>
    %52 = tpu.matmul %0, %51, %cst_21 {dimension_numbers = #tpu.dot_dimension_numbers<[1], [0], [0], [1], [0, 0, 1, 1], [], []>} : vector<16x256xbf16>, vector<256x128xbf16>, vector<16x128xf32> -> vector<16x128xf32>
    %c0_22 = arith.constant 0 : index
    %c256_23 = arith.constant 256 : index
    %53 = vector.load %arg5[%c0_22, %c256_23] : memref<1x512xf32, #tpu.memory_space<vmem>>, vector<1x128xf32>
    %54 = vector.broadcast %53 : vector<1x128xf32> to vector<16x128xf32>
    %55 = arith.addf %52, %54 : vector<16x128xf32>
    %cst_24 = arith.constant dense<0xFF800000> : vector<16xf32>
    %56 = vector.multi_reduction <maximumf>, %55, %cst_24 [1] : vector<16x128xf32> to vector<16xf32>
    %57 = vector.shape_cast %56 : vector<16xf32> to vector<16x1xf32>
    %58 = vector.broadcast %57 : vector<16x1xf32> to vector<16x128xf32>
    %59 = arith.subf %55, %58 : vector<16x128xf32>
    %60 = math.exp %59 : vector<16x128xf32>
    %61 = vector.extract_strided_slice %15 {offsets = [0, 2], sizes = [16, 1], strides = [1, 1]} : vector<16x128xf32> to vector<16x1xf32>
    %cst_25 = arith.constant dense<0.000000e+00> : vector<16xf32>
    %62 = vector.multi_reduction <add>, %60, %cst_25 [1] : vector<16x128xf32> to vector<16xf32>
    %63 = vector.shape_cast %62 : vector<16xf32> to vector<16x1xf32>
    %64 = tpu.reciprocal %63 {approx = true} : vector<16x1xf32> -> vector<16x1xf32>
    %65 = arith.mulf %61, %64 : vector<16x1xf32>
    %66 = vector.broadcast %65 : vector<16x1xf32> to vector<16x128xf32>
    %67 = arith.mulf %60, %66 : vector<16x128xf32>
    %68 = arith.addf %50, %67 : vector<16x128xf32>
    %c0_26 = arith.constant 0 : index
    %c384 = arith.constant 384 : index
    %69 = vector.load %arg4[%c0_26, %c384] : memref<256x512xbf16, #tpu.memory_space<vmem>>, vector<256x128xbf16>
    %cst_27 = arith.constant dense<0.000000e+00> : vector<16x128xf32>
    %70 = tpu.matmul %0, %69, %cst_27 {dimension_numbers = #tpu.dot_dimension_numbers<[1], [0], [0], [1], [0, 0, 1, 1], [], []>} : vector<16x256xbf16>, vector<256x128xbf16>, vector<16x128xf32> -> vector<16x128xf32>
    %c0_28 = arith.constant 0 : index
    %c384_29 = arith.constant 384 : index
    %71 = vector.load %arg5[%c0_28, %c384_29] : memref<1x512xf32, #tpu.memory_space<vmem>>, vector<1x128xf32>
    %72 = vector.broadcast %71 : vector<1x128xf32> to vector<16x128xf32>
    %73 = arith.addf %70, %72 : vector<16x128xf32>
    %cst_30 = arith.constant dense<0xFF800000> : vector<16xf32>
    %74 = vector.multi_reduction <maximumf>, %73, %cst_30 [1] : vector<16x128xf32> to vector<16xf32>
    %75 = vector.shape_cast %74 : vector<16xf32> to vector<16x1xf32>
    %76 = vector.broadcast %75 : vector<16x1xf32> to vector<16x128xf32>
    %77 = arith.subf %73, %76 : vector<16x128xf32>
    %78 = math.exp %77 : vector<16x128xf32>
    %79 = vector.extract_strided_slice %15 {offsets = [0, 3], sizes = [16, 1], strides = [1, 1]} : vector<16x128xf32> to vector<16x1xf32>
    %cst_31 = arith.constant dense<0.000000e+00> : vector<16xf32>
    %80 = vector.multi_reduction <add>, %78, %cst_31 [1] : vector<16x128xf32> to vector<16xf32>
    %81 = vector.shape_cast %80 : vector<16xf32> to vector<16x1xf32>
    %82 = tpu.reciprocal %81 {approx = true} : vector<16x1xf32> -> vector<16x1xf32>
    %83 = arith.mulf %79, %82 : vector<16x1xf32>
    %84 = vector.broadcast %83 : vector<16x1xf32> to vector<16x128xf32>
    %85 = arith.mulf %78, %84 : vector<16x128xf32>
    %86 = arith.addf %68, %85 : vector<16x128xf32>
    %c0_32 = arith.constant 0 : index
    %c0_33 = arith.constant 0 : index
    %87 = vector.load %arg6[%c0_32, %c0_33] : memref<16x128xf32, #tpu.memory_space<vmem>>, vector<16x128xf32>
    tpu.vector_store %arg6[%c0_32, %c0_33], %86 {strides = array<i32>} : memref<16x128xf32, #tpu.memory_space<vmem>>, vector<16x128xf32>,
    return
  }
  func.func @transform_0(%arg0: i32) -> (i32, i32) {
    %c0_i32 = arith.constant 0 : i32
    %c0_i32_0 = arith.constant 0 : i32
    return %arg0, %c0_i32 : i32, i32
  }
  func.func @transform_1(%arg0: i32) -> (i32, i32) {
    %c0_i32 = arith.constant 0 : i32
    %c0_i32_0 = arith.constant 0 : i32
    %c0_i32_1 = arith.constant 0 : i32
    return %c0_i32, %c0_i32_0 : i32, i32
  }
  func.func @transform_2(%arg0: i32) -> (i32, i32) {
    %c0_i32 = arith.constant 0 : i32
    %c0_i32_0 = arith.constant 0 : i32
    %c0_i32_1 = arith.constant 0 : i32
    return %c0_i32, %c0_i32_0 : i32, i32
  }
  func.func @transform_3(%arg0: i32) -> (i32, i32) {
    %c0_i32 = arith.constant 0 : i32
    %c0_i32_0 = arith.constant 0 : i32
    %c0_i32_1 = arith.constant 0 : i32
    return %c0_i32, %c0_i32_0 : i32, i32
  }
  func.func @transform_4(%arg0: i32) -> (i32, i32) {
    %c0_i32 = arith.constant 0 : i32
    %c0_i32_0 = arith.constant 0 : i32
    %c0_i32_1 = arith.constant 0 : i32
    return %c0_i32, %c0_i32_0 : i32, i32
  }
  func.func @transform_5(%arg0: i32) -> (i32, i32) {
    %c0_i32 = arith.constant 0 : i32
    %c0_i32_0 = arith.constant 0 : i32
    return %arg0, %c0_i32 : i32, i32
  }
}

</mosaic_0001>

<bundles_post_ra>
// kernel: tpu_custom_call.1
= control target key start
LH: loop header
LB: loop body
LE: loop exit
PB: predicated region body
PF: predicated region fallthrough
CT: control target
= control target key end

     0   :  { %10 = vsyncpa [#allocation3], 0  ;;  %s2347_s0 = inlined_call_operand.hbm [shape: bf16[48,256], index: 0, kind: input, shape index: {}]   ;;  %s2348_s1 = inlined_call_operand.hbm [shape: bf16[256,128], index: 1, kind: input, shape index: {}]   ;;  %s2349_s2 = inlined_call_operand.vmem [shape: f32[1,128], index: 2, kind: input, shape index: {}]   ;;  %s2350_s3 = inlined_call_operand.hbm [shape: bf16[256,512], index: 3, kind: input, shape index: {}]   ;;  %s2351_s4 = inlined_call_operand.vmem [shape: f32[1,512], index: 4, kind: input, shape index: {}]   ;;  %s2352_s5 = inlined_call_operand.hbm [shape: f32[48,128], index: 5, kind: output, shape index: {}]  }
   0x1   :  { %12 = vsyncpa [#allocation3 + $0x1], 0 }
   0x2   :  { %13 = vsyncpa [#allocation6], 0 }
   0x3   :  { %14 = vsyncpa [#allocation4], 0 }
   0x4   :  { %16 = vsyncpa [#allocation4 + $0x1], 0  ;;  %s2053_s18 = smov 0   ;;  %s2055_s19 = smov 0  }
   0x5   :  { %s2057_s20 = smov 0   ;;  %s2059_s21 = smov 0  }
   0x6 LB: > { %s2074_s22 = sadd.s32 4294967295, %s2005_s21   ;;  %s1420_s23 = sadd.s32 4294967294, %s2005_s21   ;;  %s2005_s21 = sphi %s2059_s21, %s2371_s21   ;;  %s2001_s20 = sphi %s2057_s20, %s2370_s20   ;;  %s1997_s19 = sphi %s2055_s19, %s2369_s19   ;;  %s1993_s18 = sphi %s2053_s18, %s2368_s18  }
   0x7   : > { %p42_p0 = scmp.ne.s32.totalorder %s1997_s19, %s1993_s18  ;;  %p2353_p1 = scmp.eq.s32.totalorder %s2074_s22, 0 }
   0x8   : > { %p156_p3 = scmp.eq.s32.totalorder %s1420_s23, 2  ;;  %p1421_p5 = scmp.ge.s32.totalorder %s2005_s21, 1 }
   0x9   : > { %p2083_p4 = por %p2353_p1, %p42_p0  ;;  %p163_p7 = scmp.lt.s32.totalorder %s2005_s21, 4 }
   0xa   : > { %p2088_p6 = por %p156_p3, %p42_p0  ;;  %s2007_s27 = smov [#allocation5]  }
   0xb   : > { %s2356_s24 = scalar_select %p2083_p4, 1, 0 }
   0xc   : > { %s2357_s25 = scalar_select %p2088_p6, 1, 0 }
   0xd   : > { %p2093_p8 = pnand %p1421_p5, %p163_p7  ;;  %s175_s28 = sshll.u32 %s2007_s27, 4  ;;  %s176_s28 = int_to_ptr.vmem [resolvable:$true] %s175_s28 }
   0xe   : > { %s2008_s30 = smov [#allocation7]   ;;  %s1849_s9 = scalar_lea.hbm %s2348_s1, 2048 }
   0xf   : > { %s2358_s26 = scalar_select %p2093_p8, 1, 0 }
  0x10   : > { %p1651_p9 = pneg %p2093_p8  ;;  %s191_s6 = sshll.u32 %s2008_s30, 4  ;;  %s2105_s6 = int_to_ptr.vmem [resolvable:$true] %s191_s6 }
  0x11   : > { %p1850_p11 = scmp.ne.s32.totalorder %s2348_s1, %s1849_s9  ;;  %p1856_p3 = scmp.lt.u32.totalorder %s1849_s9, %s2348_s1 }
  0x12   : > { %p2101_p10 = pnand %p1651_p9, %p2353_p1 }
  0x14   : > { %p1851_p12 = pneg %p2101_p10 }
  0x16   : > { %p1852_p13 = pnand %p1851_p12, %p1850_p11 }
  0x18   : > { %p1853_p0 = pneg %p1852_p13 }
  0x1a   : > { %p1858_p5 = pnand %p1856_p3, %p1853_p0 }
  0x1c   : > { %1861 = shalt.err (!%p1858_p5)
}
  0x1d   : > { %s1862_s14 = scalar_lea.vmem %s176_s28, 2048  ;;  %p1870_p2 = scmp.lt.s32.totalorder %s176_s28, %s176_s28 }
  0x1e   : > { %p1863_p7 = scmp.ne.s32.totalorder %s176_s28, %s1862_s14  ;;  %p1871_p6 = scmp.lt.s32.totalorder %s1862_s14, %s1862_s14 }
  0x20   : > { %p1865_p9 = pnand %p1863_p7, %p1851_p12  ;;  %p1872_p4 = por %p1871_p6, %p1870_p2 }
  0x22   : > { %p1866_p1 = pneg %p1865_p9 }
  0x24   : > { %p1873_p8 = pnand %p1872_p4, %p1866_p1 }
  0x26   : > { %1876 = shalt.err (!%p1873_p8)
}
  0x27   : > { %s2009_s15 = smov 64   ;;  %s2010_s16 = smov 4  }
  0x28   : > { %1654 = dma.hbm_to_vmem [thread:$0]  (!%p2101_p10), %s2348_s1, 2048, %s176_s28, [#allocation6], %s2009_s15, %s2009_s15, %s2010_s16  }
  0x29   : > { %s1877_s7 = scalar_lea.hbm %s2350_s3, 8192 }
  0x2a   : > { %p1878_p11 = scmp.ne.s32.totalorder %s2350_s3, %s1877_s7  ;;  %p1884_p4 = scmp.lt.u32.totalorder %s1877_s7, %s2350_s3 }
  0x2c   : > { %p1880_p1 = pnand %p1878_p11, %p1851_p12 }
  0x2e   : > { %p1881_p2 = pneg %p1880_p1 }
  0x30   : > { %p1886_p6 = pnand %p1884_p4, %p1881_p2 }
  0x32   : > { %1889 = shalt.err (!%p1886_p6)
}
  0x33   : > { %s1890_s28 = scalar_lea.vmem %s2105_s6, 8192  ;;  %p1898_p3 = scmp.lt.s32.totalorder %s2105_s6, %s2105_s6 }
  0x34   : > { %p1891_p8 = scmp.ne.s32.totalorder %s2105_s6, %s1890_s28  ;;  %p1899_p5 = scmp.lt.s32.totalorder %s1890_s28, %s1890_s28 }
  0x36   : > { %p1893_p13 = pnand %p1891_p8, %p1851_p12  ;;  %p1900_p7 = por %p1899_p5, %p1898_p3 }
  0x38   : > { %p1894_p0 = pneg %p1893_p13 }
  0x3a   : > { %p1901_p9 = pnand %p1900_p7, %p1894_p0 }
  0x3c   : > { %1904 = shalt.err (!%p1901_p9)
}
  0x3d   : > { %s2011_s12 = smov 256   ;;  %s2012_s13 = smov 16  }
  0x3e   : > { %1657 = dma.hbm_to_vmem [thread:$0]  (!%p2101_p10), %s2350_s3, 8192, %s2105_s6, [#allocation6], %s2011_s12, %s2011_s12, %s2012_s13  }
  0x3f   : > { %s2155_s16 = sadd.s32 1, %s2005_s21   ;;  %s29_s23 = sadd.s32 1, %s2001_s20 }
  0x40   : > { %s26_s17 = ssub.s32 %s2005_s21, %s2155_s16  ;;  %p36_p11 = scmp.ne.s32.totalorder %s2001_s20, %s1997_s19 }
  0x41   : > { %p27_p12 = scmp.eq.s32.totalorder %s26_s17, 0  ;;  %p37_p1 = scmp.eq.s32.totalorder %s2005_s21, 0 }
  0x42   : > { %p2360_p4 = scmp.eq.s32.totalorder %s2074_s22, 2  ;;  %p1668_p8 = scmp.lt.s32.totalorder %s2005_s21, 3 }
  0x43   : > { %s2164_s27 = scalar_select %p27_p12, %s2001_s20, %s29_s23  }
  0x44   : > { %p38_p2 = por %p37_p1, %p36_p11  ;;  %p2168_p6 = por %p2360_p4, %p36_p11 }
  0x45   : > { %s208_s29 = sand.u32 1, %s2001_s20   ;;  %s1527_s6 = sshll.u32 %s2005_s21, 8 }
  0x46   : > { %s1425_s7 = sshll.u32 %s208_s29, 4  ;;  %s2178_s10 = scalar_lea.hbm %s2347_s0, %s1527_s6 }
  0x47   : > { %s212_s11 = scalar_lea.vmem [#allocation2], %s1425_s7  ;;  %p2182_p10 = pnand %p1668_p8, %p38_p2 }
  0x48   : > { %s220_s28 = sshll.u32 %s212_s11, 4  ;;  %s2186_s13 = scalar_lea.sflag [#allocation3], %s208_s29  ;;  %s2180_s28 = int_to_ptr.vmem [resolvable:$true] %s220_s28 }
  0x49   : > { %s1905_s14 = scalar_lea.hbm %s2178_s10, 256  ;;  %p1907_p0 = pneg %p2182_p10 }
  0x4a   : > { %p1906_p13 = scmp.ne.s32.totalorder %s2178_s10, %s1905_s14  ;;  %s1910_s23 = scalar_lea.hbm %s2347_s0, 768 }
  0x4b   : > { %p1911_p7 = scmp.lt.u32.totalorder %s2178_s10, %s2347_s0  ;;  %p1912_p9 = scmp.lt.u32.totalorder %s1910_s23, %s1905_s14 }
  0x4c   : > { %p1908_p3 = pnand %p1907_p0, %p1906_p13  ;;  %p1914_p11 = scmp.lt.u32.totalorder %s1905_s14, %s2178_s10 }
  0x4d   : > { %p1913_p12 = por %p1912_p9, %p1911_p7 }
  0x4e   : > { %p1909_p5 = pneg %p1908_p3 }
  0x4f   : > { %p1915_p1 = por %p1914_p11, %p1913_p12 }
  0x51   : > { %p1916_p2 = pnand %p1915_p1, %p1909_p5 }
  0x53   : > { %1919 = shalt.err (!%p1916_p2)
}
  0x54   : > { %s1920_s29 = scalar_lea.vmem %s2180_s28, 256  ;;  %s2013_s8 = smov [#allocation2]  }
  0x55   : > { %p1921_p4 = scmp.ne.s32.totalorder %s2180_s28, %s1920_s29  ;;  %s1925_s9 = sshll.u32 %s2013_s8, 4  ;;  %s1926_s9 = int_to_ptr.vmem [resolvable:$false] %s1925_s9 }
  0x56   : > { %s1927_s11 = scalar_lea.vmem %s1926_s9, 512  ;;  %p1928_p3 = scmp.lt.s32.totalorder %s2180_s28, %s1926_s9 }
  0x57   : > { %p1923_p8 = pnand %p1921_p4, %p1907_p0  ;;  %p1929_p7 = scmp.lt.s32.totalorder %s1927_s11, %s1920_s29 }
  0x59   : > { %p1924_p13 = pneg %p1923_p8  ;;  %p1930_p9 = por %p1929_p7, %p1928_p3 }
  0x5b   : > { %p1931_p12 = pnand %p1930_p9, %p1924_p13 }
  0x5d   : > { %1934 = shalt.err (!%p1931_p12)
}
  0x5e   : > { %s2014_s14 = smov 128   ;;  %s2015_s15 = smov 8  }
  0x5f   : > { %1661 = dma.hbm_to_vmem [thread:$0]  (!%p2182_p10), %s2178_s10, 256, %s2180_s28, %s2186_s13, %s2014_s14, %s2014_s14, %s2015_s15  }
  0x60   : > { %p2363_p0 = scmp.ne.s32.totalorder %s2358_s26, 0 }
  0x61   : > { %s2217_s17 = sand.u32 (!%p2363_p0), 1, %s1997_s19   ;;  %p2364_p5 = scmp.ne.s32.totalorder (!%p2363_p0), %s2356_s24, 0 }
  0x62   : > { %232 = sbr.rel (%p2363_p0) target bundleno = 887 (0x377), region = 40  ;;  %s1430_s23 = sshll.u32 (!%p2363_p0), %s2217_s17, 4 }
  0x63   : > { %s235_s7 = scalar_lea.sflag (!%p2363_p0), [#allocation3], %s2217_s17  ;;  %s2223_s6 = scalar_lea.vmem (!%p2363_p0), [#allocation2], %s1430_s23 }
  0x69   : > { %1980 = dma.done.wait (%p2364_p5), %s235_s7, 256  }
  0x6a   : > { %1982 = vsyncadd (%p2364_p5), %s235_s7, 4294967040  ;;  %p2365_p10 = scmp.eq.s32.totalorder %s2074_s22, 0 }
  0x6c   : > { %1984 = dma.done.wait (%p2365_p10), [#allocation6], 10240   ;;  %p2366_p11 = pmov %p2365_p10 }
  0x6d   : > { %v1726_v0 = vld [vmem:[#allocation5 + $0x40] sm:$0xff]   ;;  %v1730_v4 = vld [vmem:[#allocation5 + $0x48] sm:$0xff]   ;;  %v1734_v8 = vld [vmem:[#allocation5 + $0x50] sm:$0xff]   ;;  %s272_s14 = scalar_lea.vmem [#allocation8], %s1430_s23  ;;  %s1528_s7 = sshll.u32 %s2074_s22, 8 }
  0x6e   : > { %1986 = vsyncadd (%p2366_p11), [#allocation6], 4294957056  ;;  %v1727_v1 = vld [vmem:[#allocation7 + $0x100] ss:$16 sps:$4 sm:$0xff]   ;;  %1529 = vmatprep.subr.bf16.mxu0 %v1726_v0  ;;  %v1732_v6 = vld [vmem:[#allocation5 + $0x8] sm:$0xff]   ;;  %s1328_s15 = sshll.u32 %s272_s14, 4  ;;  %s2304_s26 = scalar_lea.hbm %s2352_s5, %s1528_s7  ;;  %s2298_s15 = int_to_ptr.vmem [resolvable:$true] %s1328_s15 }
  0x6f   : > { %v1728_v2 = vld [vmem:[#allocation5] sm:$0xff]   ;;  %1551 = vmatprep.subr.bf16.mxu1 %v1727_v1  ;;  %v1736_v10 = vld [vmem:[#allocation5 + $0x10] sm:$0xff]   ;;  %v1738_v12 = vld [vmem:[#allocation5 + $0x58] sm:$0xff]   ;;  %s1315_s23 = scalar_lea.sflag [#allocation4], %s2217_s17  ;;  %s1935_s10 = scalar_lea.vmem %s2298_s15, 256 }
  0x70   : > { %v1729_v3 = vld [vmem:[#allocation7] ss:$16 sps:$4 sm:$0xff]   ;;  %1530 = vmatpush3.bf16.msra.mxu0 %v1728_v2  ;;  %v1740_v14 = vld [vmem:[#allocation5 + $0x18] sm:$0xff]   ;;  %v1746_v20 = vld [vmem:[#allocation5 + $0x68] sm:$0xff]   ;;  %p1936_p1 = scmp.ne.s32.totalorder %s2298_s15, %s1935_s10  ;;  %s2020_s22 = smov [#allocation8]  }
  0x71   : > { %1552 = vmatpush3.bf16.msra.mxu1 %v1729_v3  ;;  %v1731_v5 = vld [vmem:[#allocation7 + $0x120] ss:$16 sps:$4 sm:$0xff]   ;;  %1531 = vmatprep.subr.bf16.mxu0 %v1730_v4  ;;  %v1748_v22 = vld [vmem:[#allocation5 + $0x28] sm:$0xff]   ;;  %v1754_v28 = vld [vmem:[#allocation5 + $0x78] sm:$0xff]   ;;  %s1939_s28 = sshll.u32 %s2020_s22, 4  ;;  %s1940_s28 = int_to_ptr.vmem [resolvable:$false] %s1939_s28 }
  0x72   : > { %1553 = vmatprep.subr.bf16.mxu1 %v1731_v5  ;;  %v1733_v7 = vld [vmem:[#allocation7 + $0x20] ss:$16 sps:$4 sm:$0xff]   ;;  %v1756_v30 = vld [vmem:[#allocation5 + $0x38] sm:$0xff]   ;;  %v1761_v34 = vld [vmem:[#allocation7 + $0x104] ss:$16 sps:$4 sm:$0xff]   ;;  %p1937_p2 = pnand %p1936_p1, %p2168_p6  ;;  %s1941_s12 = scalar_lea.vmem %s1940_s28, 512 }
  0x73   : > { %v1735_v9 = vld [vmem:[#allocation7 + $0x140] ss:$16 sps:$4 sm:$0xff]   ;;  %v2234_v32 = vld [vmem:[%s2223_s6 + $0x4] ss:$8 sps:$4 sm:$0xff]   ;;  %v1764_v37 = vld [vmem:[#allocation7 + $0x108] ss:$16 sps:$4 sm:$0xff]   ;;  %p1942_p8 = scmp.lt.s32.totalorder %s2298_s15, %s1940_s28  ;;  %p1943_p13 = scmp.lt.s32.totalorder %s1941_s12, %s1935_s10 }
  0x74   : > { %1532 = vmatpush3.bf16.msra.mxu0 %v1732_v6  ;;  %v1737_v11 = vld [vmem:[#allocation7 + $0x40] ss:$16 sps:$4 sm:$0xff]   ;;  %455 = vmatprep.mubr.bf16.mxu0 %v2234_v32  ;;  %v1762_v35 = vld [vmem:[#allocation7 + $0x4] ss:$16 sps:$4 sm:$0xff]   ;;  %v1766_v39 = vld [vmem:[#allocation7 + $0x8] ss:$16 sps:$4 sm:$0xff]   ;;  %p1938_p4 = pneg %p1937_p2 }
  0x75   : > { %1554 = vmatpush3.bf16.msra.mxu1 %v1733_v7  ;;  %1533 = vmatprep.subr.bf16.mxu0 %v1734_v8  ;;  %v1739_v13 = vld [vmem:[#allocation7 + $0x160] ss:$16 sps:$4 sm:$0xff]   ;;  %v1763_v36 = vld [vmem:[#allocation7 + $0x124] ss:$16 sps:$4 sm:$0xff]   ;;  %v1768_v41 = vld [vmem:[#allocation7 + $0x128] ss:$16 sps:$4 sm:$0xff]   ;;  %p1944_p3 = por %p1943_p13, %p1942_p8 }
  0x76   : > { %1555 = vmatprep.subr.bf16.mxu1 %v1735_v9  ;;  %v1741_v15 = vld [vmem:[#allocation7 + $0x60] ss:$16 sps:$4 sm:$0xff]   ;;  %649 = vmatprep.mubr.bf16.mxu1 %v2234_v32  ;;  %v1765_v38 = vld [vmem:[#allocation7 + $0x24] ss:$16 sps:$4 sm:$0xff]   ;;  %v1770_v43 = vld [vmem:[#allocation7 + $0x28] ss:$16 sps:$4 sm:$0xff]  }
  0x77   : > { %v1742_v16 = vld [vmem:[#allocation5 + $0x60] sm:$0xff]   ;;  %v1750_v24 = vld [vmem:[#allocation5 + $0x70] sm:$0xff]   ;;  %v1772_v45 = vld [vmem:[#allocation7 + $0x148] ss:$16 sps:$4 sm:$0xff]   ;;  %p1945_p7 = pnand %p1944_p3, %p1938_p4 }
  0x78   : > { %1534 = vmatpush3.bf16.msra.mxu0 %v1736_v10  ;;  %v1743_v17 = vld [vmem:[#allocation7 + $0x180] ss:$16 sps:$4 sm:$0xff]   ;;  %v1767_v40 = vld [vmem:[#allocation7 + $0x144] ss:$16 sps:$4 sm:$0xff]   ;;  %v1774_v47 = vld [vmem:[#allocation7 + $0x48] ss:$16 sps:$4 sm:$0xff]  }
  0x79   : > { %1556 = vmatpush3.bf16.msra.mxu1 %v1737_v11  ;;  %1535 = vmatprep.subr.bf16.mxu0 %v1738_v12  ;;  %v1744_v18 = vld [vmem:[#allocation5 + $0x20] sm:$0xff]   ;;  %v1752_v26 = vld [vmem:[#allocation5 + $0x30] sm:$0xff]   ;;  %v1776_v49 = vld [vmem:[#allocation7 + $0x168] ss:$16 sps:$4 sm:$0xff]  }
  0x7a   : > { %1557 = vmatprep.subr.bf16.mxu1 %v1739_v13  ;;  %v1745_v19 = vld [vmem:[#allocation7 + $0x80] ss:$16 sps:$4 sm:$0xff]   ;;  %v1769_v42 = vld [vmem:[#allocation7 + $0x44] ss:$16 sps:$4 sm:$0xff]   ;;  %v1778_v51 = vld [vmem:[#allocation7 + $0x68] ss:$16 sps:$4 sm:$0xff]  }
  0x7b   : > { %v1747_v21 = vld [vmem:[#allocation7 + $0x1a0] ss:$16 sps:$4 sm:$0xff]   ;;  %v1771_v44 = vld [vmem:[#allocation7 + $0x164] ss:$16 sps:$4 sm:$0xff]   ;;  %v1780_v53 = vld [vmem:[#allocation7 + $0x188] ss:$16 sps:$4 sm:$0xff]  }
  0x7c   : > { %1536 = vmatpush3.bf16.msra.mxu0 %v1740_v14  ;;  %v1749_v23 = vld [vmem:[#allocation7 + $0xa0] ss:$16 sps:$4 sm:$0xff]   ;;  %v1773_v46 = vld [vmem:[#allocation7 + $0x64] ss:$16 sps:$4 sm:$0xff]   ;;  %v1782_v55 = vld [vmem:[#allocation7 + $0x88] ss:$16 sps:$4 sm:$0xff]  }
  0x7d   : > { %1558 = vmatpush3.bf16.msra.mxu1 %v1741_v15  ;;  %1537 = vmatprep.subr.bf16.mxu0 %v1742_v16  ;;  %v1751_v25 = vld [vmem:[#allocation7 + $0x1c0] ss:$16 sps:$4 sm:$0xff]   ;;  %v1775_v48 = vld [vmem:[#allocation7 + $0x184] ss:$16 sps:$4 sm:$0xff]   ;;  %v1784_v57 = vld [vmem:[#allocation7 + $0x1a8] ss:$16 sps:$4 sm:$0xff]  }
  0x7e   : > { %1559 = vmatprep.subr.bf16.mxu1 %v1743_v17  ;;  %v1753_v27 = vld [vmem:[#allocation7 + $0xc0] ss:$16 sps:$4 sm:$0xff]   ;;  %v1777_v50 = vld [vmem:[#allocation7 + $0x84] ss:$16 sps:$4 sm:$0xff]   ;;  %v1786_v59 = vld [vmem:[#allocation7 + $0xa8] ss:$16 sps:$4 sm:$0xff]  }
  0x7f   : > { %v1755_v29 = vld [vmem:[#allocation7 + $0x1e0] ss:$16 sps:$4 sm:$0xff]   ;;  %v1779_v52 = vld [vmem:[#allocation7 + $0x1a4] ss:$16 sps:$4 sm:$0xff]   ;;  %v1788_v61 = vld [vmem:[#allocation7 + $0x1c8] ss:$16 sps:$4 sm:$0xff]  }
  0x80   : > { %1538 = vmatpush3.bf16.msra.mxu0 %v1744_v18  ;;  %v1757_v31 = vld [vmem:[#allocation7 + $0xe0] ss:$16 sps:$4 sm:$0xff]   ;;  %v1781_v54 = vld [vmem:[#allocation7 + $0xa4] ss:$16 sps:$4 sm:$0xff]   ;;  %v1790_v63 = vld [vmem:[#allocation7 + $0xc8] ss:$16 sps:$4 sm:$0xff]  }
  0x81   : > { %1560 = vmatpush3.bf16.msra.mxu1 %v1745_v19  ;;  %1539 = vmatprep.subr.bf16.mxu0 %v1746_v20  ;;  %v2237_v33 = vld [vmem:[%s2223_s6] ss:$8 sps:$4 sm:$0xff]   ;;  %v1783_v56 = vld [vmem:[#allocation7 + $0x1c4] ss:$16 sps:$4 sm:$0xff]   ;;  %v1792_v1 = vld [vmem:[#allocation7 + $0x10c] ss:$16 sps:$4 sm:$0xff]  }
  0x82   : > { %1561 = vmatprep.subr.bf16.mxu1 %v1747_v21  ;;  %v1785_v58 = vld [vmem:[#allocation7 + $0xc4] ss:$16 sps:$4 sm:$0xff]   ;;  %v1791_v0 = vld [vmem:[#allocation7 + $0x1e8] ss:$16 sps:$4 sm:$0xff]   ;;  %v1794_v3 = vld [vmem:[#allocation7 + $0xc] ss:$16 sps:$4 sm:$0xff]  }
  0x83   : > { %v1787_v60 = vld [vmem:[#allocation7 + $0x1e4] ss:$16 sps:$4 sm:$0xff]   ;;  %v1793_v2 = vld [vmem:[#allocation7 + $0xe8] ss:$16 sps:$4 sm:$0xff]   ;;  %v1795_v4 = vld [vmem:[#allocation7 + $0x12c] ss:$16 sps:$4 sm:$0xff]  }
  0x84   : > { %1540 = vmatpush3.bf16.msra.mxu0 %v1748_v22  ;;  %v1789_v62 = vld [vmem:[#allocation7 + $0xe4] ss:$16 sps:$4 sm:$0xff]   ;;  %v1796_v5 = vld [vmem:[#allocation7 + $0x2c] ss:$16 sps:$4 sm:$0xff]   ;;  %v1434_v21 = vld [vmem:[%s2349_s2] ss:$0 sm:$0xff] }
  0x85   : > { %1562 = vmatpush3.bf16.msra.mxu1 %v1749_v23  ;;  %1541 = vmatprep.subr.bf16.mxu0 %v1750_v24  ;;  %v1797_v6 = vld [vmem:[#allocation7 + $0x14c] ss:$16 sps:$4 sm:$0xff]  }
  0x86   : > { %1563 = vmatprep.subr.bf16.mxu1 %v1751_v25  ;;  %v1798_v7 = vld [vmem:[#allocation7 + $0x4c] ss:$16 sps:$4 sm:$0xff]   ;;  %v1453_v25 = vld [vmem:[%s2351_s4] ss:$0 sm:$0xff] }
  0x87   : > { %v1799_v8 = vld [vmem:[#allocation7 + $0x16c] ss:$16 sps:$4 sm:$0xff]  }
  0x88   : > { %1542 = vmatpush3.bf16.msra.mxu0 %v1752_v26  ;;  %v1800_v9 = vld [vmem:[#allocation7 + $0x6c] ss:$16 sps:$4 sm:$0xff]  }
  0x89   : > { %1564 = vmatpush3.bf16.msra.mxu1 %v1753_v27  ;;  %1543 = vmatprep.subr.bf16.mxu0 %v1754_v28  ;;  %v1801_v10 = vld [vmem:[#allocation7 + $0x18c] ss:$16 sps:$4 sm:$0xff]  }
  0x8a   : > { %1565 = vmatprep.subr.bf16.mxu1 %v1755_v29  ;;  %v1802_v11 = vld [vmem:[#allocation7 + $0x8c] ss:$16 sps:$4 sm:$0xff]  }
  0x8b   : > { %v1803_v12 = vld [vmem:[#allocation7 + $0x1ac] ss:$16 sps:$4 sm:$0xff]  }
  0x8c   : > { %1544 = vmatpush3.bf16.msra.mxu0 %v1756_v30  ;;  %v1804_v13 = vld [vmem:[#allocation7 + $0xac] ss:$16 sps:$4 sm:$0xff]  }
  0x8d   : > { %1566 = vmatpush3.bf16.msra.mxu1 %v1757_v31  ;;  %1573 = vmatprep.subr.bf16.mxu0 %v1761_v34  ;;  %v1805_v14 = vld [vmem:[#allocation7 + $0x1cc] ss:$16 sps:$4 sm:$0xff]  }
  0x8e   : > { %1595 = vmatprep.subr.bf16.mxu1 %v1764_v37  ;;  %v1806_v15 = vld [vmem:[#allocation7 + $0xcc] ss:$16 sps:$4 sm:$0xff]  }
  0x8f   : > { %456 = vmatmul.mubr.bf16.vlgmr.msra.gmra.mrb[0].mxu0 %v2237_v33  ;;  %v1807_v16 = vld [vmem:[#allocation7 + $0x1ec] ss:$16 sps:$4 sm:$0xff]  }
  0x90   : > { %650 = vmatmul.mubr.bf16.vlgmr.msra.gmra.mrb[0].mxu1 %v2237_v33  ;;  %1574 = vmatpush3.bf16.msra.mxu0 %v1762_v35  ;;  %v1808_v17 = vld [vmem:[#allocation7 + $0xec] ss:$16 sps:$4 sm:$0xff]  }
  0x91   : > { %855 = vmatprep.mubr.bf16.mxu0 %v2234_v32  ;;  %1575 = vmatprep.subr.bf16.mxu0 %v1763_v36 }
  0x92   : > { %1063 = vmatprep.mubr.bf16.mxu1 %v2234_v32  ;;  %1596 = vmatpush3.bf16.msra.mxu1 %v1766_v39 }
  0x93   : > { %1597 = vmatprep.subr.bf16.mxu1 %v1768_v41 }
  0x94   : > { %1576 = vmatpush3.bf16.msra.mxu0 %v1765_v38  ;;  %v1470_v38 = vld [vmem:[%s2351_s4 + $0x1] ss:$0 sm:$0xff] }
  0x95   : > { %1577 = vmatprep.subr.bf16.mxu0 %v1767_v40 }
  0x96   : > { %1598 = vmatpush3.bf16.msra.mxu1 %v1770_v43 }
  0x97   : > { %1599 = vmatprep.subr.bf16.mxu1 %v1772_v45 }
  0x98   : > { %1578 = vmatpush3.bf16.msra.mxu0 %v1769_v42 }
  0x99   : > { %1579 = vmatprep.subr.bf16.mxu0 %v1771_v44 }
  0x9a   : > { %1600 = vmatpush3.bf16.msra.mxu1 %v1774_v47 }
  0x9b   : > { %1601 = vmatprep.subr.bf16.mxu1 %v1776_v49 }
  0x9c   : > { %1580 = vmatpush3.bf16.msra.mxu0 %v1773_v46  ;;  %v1487_v46 = vld [vmem:[%s2351_s4 + $0x2] ss:$0 sm:$0xff] }
  0x9d   : > { %1581 = vmatprep.subr.bf16.mxu0 %v1775_v48 }
  0x9e   : > { %1602 = vmatpush3.bf16.msra.mxu1 %v1778_v51 }
  0x9f   : > { %1603 = vmatprep.subr.bf16.mxu1 %v1780_v53 }
  0xa0   : > { %1582 = vmatpush3.bf16.msra.mxu0 %v1777_v50 }
  0xa1   : > { %1583 = vmatprep.subr.bf16.mxu0 %v1779_v52 }
  0xa2   : > { %1604 = vmatpush3.bf16.msra.mxu1 %v1782_v55 }
  0xa3   : > { %1605 = vmatprep.subr.bf16.mxu1 %v1784_v57 }
  0xa4   : > { %1584 = vmatpush3.bf16.msra.mxu0 %v1781_v54 }
  0xa5   : > { %1585 = vmatprep.subr.bf16.mxu0 %v1783_v56  ;;  %v1504_v56 = vld [vmem:[%s2351_s4 + $0x3] ss:$0 sm:$0xff] }
  0xa6   : > { %1606 = vmatpush3.bf16.msra.mxu1 %v1786_v59 }
  0xa7   : > { %1607 = vmatprep.subr.bf16.mxu1 %v1788_v61 }
  0xa8   : > { %1586 = vmatpush3.bf16.msra.mxu0 %v1785_v58 }
  0xa9   : > { %1587 = vmatprep.subr.bf16.mxu0 %v1787_v60 }
  0xaa   : > { %1608 = vmatpush3.bf16.msra.mxu1 %v1790_v63 }
  0xab   : > { %1609 = vmatprep.subr.bf16.mxu1 %v1791_v0 }
  0xac   : > { %1588 = vmatpush3.bf16.msra.mxu0 %v1789_v62 }
  0xad   : > { %1617 = vmatprep.subr.bf16.mxu0 %v1792_v1 }
  0xae   : > { %1610 = vmatpush3.bf16.msra.mxu1 %v1793_v2 }
  0xaf   : > { %856 = vmatmul.mubr.bf16.vlgmr.msra.gmra.mrb[4].mxu0 %v2237_v33 }
  0xb0   : > { %1618 = vmatpush3.bf16.msra.mxu0 %v1794_v3  ;;  %1271 = vmatprep.mubr.bf16.mxu0 %v2234_v32 }
  0xb1   : > { %1619 = vmatprep.subr.bf16.mxu0 %v1795_v4  ;;  %1064 = vmatmul.mubr.bf16.vlgmr.msra.gmra.mrb[4].mxu1 %v2237_v33 }
  0xb4   : > { %1620 = vmatpush3.bf16.msra.mxu0 %v1796_v5 }
  0xb5   : > { %1621 = vmatprep.subr.bf16.mxu0 %v1797_v6 }
  0xb8   : > { %1622 = vmatpush3.bf16.msra.mxu0 %v1798_v7 }
  0xb9   : > { %1623 = vmatprep.subr.bf16.mxu0 %v1799_v8 }
  0xbc   : > { %1624 = vmatpush3.bf16.msra.mxu0 %v1800_v9 }
  0xbd   : > { %1625 = vmatprep.subr.bf16.mxu0 %v1801_v10 }
  0xc0   : > { %1626 = vmatpush3.bf16.msra.mxu0 %v1802_v11 }
  0xc1   : > { %1627 = vmatprep.subr.bf16.mxu0 %v1803_v12 }
  0xc4   : > { %1628 = vmatpush3.bf16.msra.mxu0 %v1804_v13 }
  0xc5   : > { %1629 = vmatprep.subr.bf16.mxu0 %v1805_v14 }
  0xc8   : > { %1630 = vmatpush3.bf16.msra.mxu0 %v1806_v15 }
  0xc9   : > { %1631 = vmatprep.subr.bf16.mxu0 %v1807_v16 }
  0xcc   : > { %1632 = vmatpush3.bf16.msra.mxu0 %v1808_v17 }
  0xcf   : > { %1272 = vmatmul.mubr.bf16.vlgmr.msra.gmra.mrb[8].mxu0 %v2237_v33 }
 0x162   : > { %v1545_v18 = vpop.f32.mrb[0].mxu0 }
 0x163   : > { %v1567_v19 = vpop.f32.mrb[0].mxu1  ;;  %v1546_v20 = vpop.f32.mrb[1].mxu0 }
 0x164   : > { %v1547_v22 = vadd.f32 %v1546_v20, %v1545_v18  ;;  %v1568_v23 = vpop.f32.mrb[1].mxu1  ;;  %v1548_v24 = vpop.f32.mrb[2].mxu0 }
 0x165   : > { %v1569_v26 = vadd.f32 %v1568_v23, %v1567_v19  ;;  %v1549_v27 = vpop.f32.mrb[3].mxu0  ;;  %v1570_v28 = vpop.f32.mrb[2].mxu1 }
 0x166   : > { %v1550_v29 = vadd.f32 %v1549_v27, %v1548_v24  ;;  %v1571_v30 = vpop.f32.mrb[3].mxu1  ;;  %v458_v31 = vadd.f32 %v1547_v22, %v1434_v21  ;;  %v2016_v27 = vmov 0  }
 0x167   : > { %v1572_v32 = vadd.f32 %v1571_v30, %v1570_v28  ;;  %v652_v33 = vadd.f32 %v1569_v26, %v1453_v25  ;;  %1718 = vset.pattern.permute.xlu0 %v2016_v27  ;;  %1719 = vset.pattern.permute.xlu1 %v2016_v27 }
 0x168   : > { %464 = vmax.xlane.f32.xlu0 %v458_v31  ;;  %v461_v35 = vadd.f32 %v1550_v29, %v1434_v21 }
 0x169   : > { %658 = vmax.xlane.f32.xlu1 %v652_v33  ;;  %v655_v34 = vadd.f32 %v1572_v32, %v1453_v25 }
 0x16c   : > { %466 = vmax.xlane.f32.xlu0 %v461_v35 }
 0x16d   : > { %660 = vmax.xlane.f32.xlu1 %v655_v34 }
 0x182   : > { %v1589_v36 = vpop.f32.mrb[4].mxu0 }
 0x183   : > { %v1590_v37 = vpop.f32.mrb[5].mxu0 }
 0x184   : > { %v1591_v39 = vadd.f32 %v1590_v37, %v1589_v36  ;;  %v1592_v40 = vpop.f32.mrb[6].mxu0  ;;  %v1611_v43 = vpop.f32.mrb[4].mxu1 }
 0x185   : > { %v1593_v41 = vpop.f32.mrb[7].mxu0  ;;  %v1612_v45 = vpop.f32.mrb[5].mxu1 }
 0x186   : > { %v1594_v42 = vadd.f32 %v1593_v41, %v1592_v40  ;;  %v858_v44 = vadd.f32 %v1591_v39, %v1470_v38  ;;  %v1613_v47 = vadd.f32 %v1612_v45, %v1611_v43  ;;  %v1614_v48 = vpop.f32.mrb[6].mxu1 }
 0x187   : > { %v1615_v50 = vpop.f32.mrb[7].mxu1 }
 0x188   : > { %864 = vmax.xlane.f32.xlu0 %v858_v44  ;;  %v861_v49 = vadd.f32 %v1594_v42, %v1470_v38  ;;  %v1616_v51 = vadd.f32 %v1615_v50, %v1614_v48  ;;  %v1066_v52 = vadd.f32 %v1613_v47, %v1487_v46 }
 0x18a   : > { %866 = vmax.xlane.f32.xlu1 %v861_v49  ;;  %v1069_v53 = vadd.f32 %v1616_v51, %v1487_v46 }
 0x18c   : > { %1072 = vmax.xlane.f32.xlu0 %v1066_v52 }
 0x18e   : > { %1074 = vmax.xlane.f32.xlu1 %v1069_v53 }
 0x1a2   : > { %v1633_v54 = vpop.f32.mrb[8].mxu0 }
 0x1a3   : > { %v1634_v55 = vpop.f32.mrb[9].mxu0 }
 0x1a4   : > { %v1635_v57 = vadd.f32 %v1634_v55, %v1633_v54  ;;  %v1636_v58 = vpop.f32.mrb[10].mxu0 }
 0x1a5   : > { %v1637_v59 = vpop.f32.mrb[11].mxu0 }
 0x1a6   : > { %v1638_v60 = vadd.f32 %v1637_v59, %v1636_v58  ;;  %v1274_v61 = vadd.f32 %v1635_v57, %v1504_v56 }
 0x1a8   : > { %1280 = vmax.xlane.f32.xlu0 %v1274_v61  ;;  %v1277_v62 = vadd.f32 %v1638_v60, %v1504_v56 }
 0x1aa   : > { %1282 = vmax.xlane.f32.xlu1 %v1277_v62 }
 0x1f5   : > { %v465_v63 = vpop.xlane.xlu0 %464 }
 0x1f6   : > { %v659_v0 = vpop.xlane.xlu1 %658  ;;  %v468_v1 = vsub.f32 %v458_v31, %v465_v63 }
 0x1f7   : > { %v662_v2 = vsub.f32 %v652_v33, %v659_v0 }
 0x1f8   : > { %v470_v3 = vmul.f32 1.442695, %v468_v1 }
 0x1f9   : > { %v664_v4 = vmul.f32 1.442695, %v662_v2  ;;  %v467_v5 = vpop.xlane.xlu0 %466 }
 0x1fa   : > { %1809 = vpow2.f32 %v470_v3  ;;  %v661_v6 = vpop.xlane.xlu1 %660  ;;  %v469_v7 = vsub.f32 %v461_v35, %v467_v5 }
 0x1fb   : > { %v663_v8 = vsub.f32 %v655_v34, %v661_v6  ;;  %1811 = vpow2.f32 %v664_v4 }
 0x1fc   : > { %v472_v9 = vmul.f32 1.442695, %v469_v7 }
 0x1fd   : > { %v666_v10 = vmul.f32 1.442695, %v663_v8 }
 0x1fe   : > { %1813 = vpow2.f32 %v472_v9 }
 0x1ff   : > { %1815 = vpow2.f32 %v666_v10 }
 0x204   : > { %v1810_v11 = vpop.eup %1809 }
 0x205   : > { %474 = vadd.xlane.f32.xlu0 %v1810_v11  ;;  %v2264_v12 = vpop.eup %1811 }
 0x208   : > { %v1814_v13 = vpop.eup %1813 }
 0x209   : > { %668 = vadd.xlane.f32.xlu0 %v2264_v12  ;;  %476 = vadd.xlane.f32.xlu1 %v1814_v13  ;;  %v2267_v14 = vpop.eup %1815 }
 0x20d   : > { %670 = vadd.xlane.f32.xlu1 %v2267_v14 }
 0x215   : > { %v865_v15 = vpop.xlane.xlu0 %864 }
 0x216   : > { %v868_v16 = vsub.f32 %v858_v44, %v865_v15 }
 0x217   : > { %v867_v17 = vpop.xlane.xlu1 %866 }
 0x218   : > { %v870_v18 = vmul.f32 1.442695, %v868_v16  ;;  %v869_v19 = vsub.f32 %v861_v49, %v867_v17 }
 0x219   : > { %v1073_v20 = vpop.xlane.xlu0 %1072 }
 0x21a   : > { %1817 = vpow2.f32 %v870_v18  ;;  %v872_v21 = vmul.f32 1.442695, %v869_v19  ;;  %v1076_v22 = vsub.f32 %v1066_v52, %v1073_v20  ;;  %v2017_v52 = vmov 3  }
 0x21b   : > { %v1075_v23 = vpop.xlane.xlu1 %1074 }
 0x21c   : > { %1819 = vpow2.f32 %v872_v21  ;;  %v1078_v24 = vmul.f32 1.442695, %v1076_v22  ;;  %v1077_v25 = vsub.f32 %v1069_v53, %v1075_v23  ;;  %v2018_v53 = vmov 1  }
 0x21e   : > { %1821 = vpow2.f32 %v1078_v24  ;;  %v1080_v26 = vmul.f32 1.442695, %v1077_v25 }
 0x220   : > { %1823 = vpow2.f32 %v1080_v26 }
 0x224   : > { %v2270_v28 = vpop.eup %1817 }
 0x225   : > { %874 = vadd.xlane.f32.xlu0 %v2270_v28 }
 0x226   : > { %v2273_v29 = vpop.eup %1819 }
 0x227   : > { %876 = vadd.xlane.f32.xlu1 %v2273_v29 }
 0x228   : > { %v2276_v30 = vpop.eup %1821 }
 0x229   : > { %1082 = vadd.xlane.f32.xlu0 %v2276_v30 }
 0x22a   : > { %v2279_v31 = vpop.eup %1823 }
 0x22b   : > { %1084 = vadd.xlane.f32.xlu1 %v2279_v31 }
 0x235   : > { %v1281_v32 = vpop.xlane.xlu0 %1280 }
 0x236   : > { %v1284_v33 = vsub.f32 %v1274_v61, %v1281_v32 }
 0x237   : > { %v1283_v34 = vpop.xlane.xlu1 %1282 }
 0x238   : > { %v1286_v35 = vmul.f32 1.442695, %v1284_v33  ;;  %v1285_v36 = vsub.f32 %v1277_v62, %v1283_v34  ;;  %v2019_v62 = vmov 2  }
 0x23a   : > { %1825 = vpow2.f32 %v1286_v35  ;;  %v1288_v37 = vmul.f32 1.442695, %v1285_v36 }
 0x23c   : > { %1827 = vpow2.f32 %v1288_v37 }
 0x244   : > { %v2282_v38 = vpop.eup %1825 }
 0x245   : > { %1290 = vadd.xlane.f32.xlu0 %v2282_v38 }
 0x246   : > { %v2285_v39 = vpop.eup %1827 }
 0x247   : > { %1292 = vadd.xlane.f32.xlu1 %v2285_v39 }
 0x292   : > { %v475_v40 = vpop.xlane.xlu0 %474 }
 0x293   : > { %1829 = vrcp.f32 %v475_v40 }
 0x296   : > { %v477_v41 = vpop.xlane.xlu1 %476  ;;  %v669_v42 = vpop.xlane.xlu0 %668 }
 0x297   : > { %1831 = vrcp.f32 %v477_v41 }
 0x298   : > { %1833 = vrcp.f32 %v669_v42 }
 0x29a   : > { %v671_v43 = vpop.xlane.xlu1 %670 }
 0x29b   : > { %1835 = vrcp.f32 %v671_v43 }
 0x29d   : > { %v1830_v44 = vpop.eup %1829 }
 0x29e   : > { %v480_v46 = vmul.f32 %v1830_v44, %v1810_v11 }
 0x2a1   : > { %v1832_v45 = vpop.eup %1831 }
 0x2a2   : > { %v1834_v47 = vpop.eup %1833  ;;  %v481_v49 = vmul.f32 %v1832_v45, %v1814_v13 }
 0x2a3   : > { %v674_v48 = vmul.f32 %v1834_v47, %v480_v46 }
 0x2a5   : > { %v1836_v50 = vpop.eup %1835  ;;  %678 = vperm.xlu0 %1718, %v674_v48  }
 0x2a6   : > { %v675_v51 = vmul.f32 %v1836_v50, %v481_v49 }
 0x2a8   : > { %683 = vperm.xlu1 %1719, %v675_v51  }
 0x2a9   : > { %1725 = vset.pattern.permute.xlu0 %v2017_v52 }
 0x2ac   : > { %1720 = vset.pattern.permute.xlu1 %v2018_v53 }
 0x2b2   : > { %v875_v54 = vpop.xlane.xlu0 %874 }
 0x2b3   : > { %1837 = vrcp.f32 %v875_v54 }
 0x2b4   : > { %v877_v56 = vpop.xlane.xlu1 %876 }
 0x2b6   : > { %v1083_v55 = vpop.xlane.xlu0 %1082 }
 0x2b7   : > { %1839 = vrcp.f32 %v1083_v55 }
 0x2b8   : > { %1841 = vrcp.f32 %v877_v56  ;;  %v1085_v58 = vpop.xlane.xlu1 %1084 }
 0x2b9   : > { %1843 = vrcp.f32 %v1085_v58 }
 0x2bd   : > { %v1838_v57 = vpop.eup %1837 }
 0x2be   : > { %v880_v59 = vmul.f32 %v1838_v57, %v480_v46 }
 0x2c0   : > { %884 = vperm.xlu1 %1720, %v880_v59  }
 0x2c1   : > { %v1840_v60 = vpop.eup %1839 }
 0x2c2   : > { %v1088_v61 = vmul.f32 %v1840_v60, %v480_v46  ;;  %v1842_v63 = vpop.eup %1841 }
 0x2c3   : > { %v881_v0 = vmul.f32 %v1842_v63, %v481_v49  ;;  %v1844_v1 = vpop.eup %1843 }
 0x2c4   : > { %1721 = vset.pattern.permute.xlu1 %v2019_v62  ;;  %v1089_v2 = vmul.f32 %v1844_v1, %v481_v49 }
 0x2c5   : > { %1092 = vperm.xlu1 %1721, %v1088_v61  }
 0x2c9   : > { %1722 = vset.pattern.permute.xlu1 %v2018_v53 }
 0x2ca   : > { %889 = vperm.xlu1 %1722, %v881_v0  }
 0x2ce   : > { %1723 = vset.pattern.permute.xlu1 %v2019_v62 }
 0x2cf   : > { %1097 = vperm.xlu1 %1723, %v1089_v2  }
 0x2d2   : > { %v1291_v3 = vpop.xlane.xlu0 %1290 }
 0x2d3   : > { %1845 = vrcp.f32 %v1291_v3  ;;  %1724 = vset.pattern.permute.xlu1 %v2017_v52 }
 0x2d4   : > { %v1293_v4 = vpop.xlane.xlu1 %1292 }
 0x2d5   : > { %1847 = vrcp.f32 %v1293_v4 }
 0x2dd   : > { %v1846_v5 = vpop.eup %1845 }
 0x2de   : > { %v1296_v6 = vmul.f32 %v1846_v5, %v480_v46 }
 0x2df   : > { %v1848_v7 = vpop.eup %1847 }
 0x2e0   : > { %1300 = vperm.xlu1 %1724, %v1296_v6   ;;  %v1297_v8 = vmul.f32 %v1848_v7, %v481_v49 }
 0x2e4   : > { %1305 = vperm.xlu1 %1724, %v1297_v8  }
 0x324   : > { %v679_v15 = vpop.permute.xlu0 %678 }
 0x325   : > { %v686_v18 = vmul.f32 %v2264_v12, %v679_v15 }
 0x327   : > { %v684_v9 = vpop.permute.xlu1 %683 }
 0x328   : > { %v687_v23 = vmul.f32 %v2267_v14, %v684_v9 }
 0x33f   : > { %v885_v10 = vpop.permute.xlu1 %884 }
 0x340   : > { %v892_v16 = vmul.f32 %v2270_v28, %v885_v10 }
 0x342   : > { %v894_v20 = vadd.f32 %v892_v16, %v686_v18 }
 0x344   : > { %v1093_v11 = vpop.permute.xlu1 %1092 }
 0x345   : > { %v1100_v19 = vmul.f32 %v2276_v30, %v1093_v11 }
 0x347   : > { %v1102_v24 = vadd.f32 %v1100_v19, %v894_v20 }
 0x349   : > { %v890_v13 = vpop.permute.xlu1 %889 }
 0x34a   : > { %v893_v21 = vmul.f32 %v2273_v29, %v890_v13 }
 0x34c   : > { %v895_v27 = vadd.f32 %v893_v21, %v687_v23 }
 0x34e   : > { %v1098_v17 = vpop.permute.xlu1 %1097 }
 0x34f   : > { %v1101_v25 = vmul.f32 %v2279_v31, %v1098_v17 }
 0x351   : > { %v1103_v30 = vadd.f32 %v1101_v25, %v895_v27 }
 0x35f   : > { %v1301_v22 = vpop.permute.xlu1 %1300 }
 0x360   : > { %v1308_v26 = vmul.f32 %v2282_v38, %v1301_v22 }
 0x362   : > { %v1310_v12 = vadd.f32 %v1308_v26, %v1102_v24 }
 0x363   : > { %v1306_v28 = vpop.permute.xlu1 %1305 }
 0x364   : > { %1312 = vst [vmem:[%s272_s14] sm:$0xff] %v1310_v12  ;;  %v1309_v14 = vmul.f32 %v2285_v39, %v1306_v28 }
 0x366   : > { %v1311_v29 = vadd.f32 %v1309_v14, %v1103_v30 }
 0x368   : > { %1313 = vst [vmem:[%s272_s14 + $0x8] sm:$0xff] %v1311_v29 }
 0x369   : > { %1948 = shalt.err (!%p1945_p7)
}
 0x36a   : > { %s1949_s13 = scalar_lea.hbm %s2304_s26, 256  ;;  %s1953_s9 = scalar_lea.hbm %s2352_s5, 768 }
 0x36b   : > { %p1950_p9 = scmp.ne.s32.totalorder %s2304_s26, %s1949_s13  ;;  %p1954_p5 = scmp.lt.u32.totalorder %s2304_s26, %s2352_s5 }
 0x36c   : > { %p1955_p10 = scmp.lt.u32.totalorder %s1953_s9, %s1949_s13  ;;  %p1957_p1 = scmp.lt.u32.totalorder %s1949_s13, %s2304_s26 }
 0x36d   : > { %p1951_p12 = pnand %p1950_p9, %p2168_p6 }
 0x36e   : > { %p1956_p11 = por %p1955_p10, %p1954_p5 }
 0x36f   : > { %p1952_p0 = pneg %p1951_p12 }
 0x370   : > { %p1958_p2 = por %p1957_p1, %p1956_p11 }
 0x372   : > { %p1959_p4 = pnand %p1958_p2, %p1952_p0 }
 0x374   : > { %1962 = shalt.err (!%p1959_p4)
}
 0x375   : > { %s2021_s7 = smov 128   ;;  %s2022_s6 = smov 8  }
 0x376   : > { %1649 = dma.vmem_to_hbm [thread:$0]  (%p2168_p6), %s2298_s15, 256, %s2304_s26, %s1315_s23, %s2021_s7, %s2021_s7, %s2022_s6  }
 0x377 PF: > { %p1671_p8 = scmp.ge.s32.totalorder %s2005_s21, 2  ;;  %s1343_s24 = sand.u32 1, %s1993_s18  }
 0x378   : > { %p2367_p13 = scmp.ne.s32.totalorder %s2357_s25, 0  ;;  %s1344_s10 = scalar_lea.sflag [#allocation4], %s1343_s24 }
 0x37a   : > { %p1663_p3 = pnand %p1671_p8, %p2367_p13 }
 0x37c   : > { %1988 = dma.done.wait (!%p1663_p3), %s1344_s10, 256  }
 0x37d   : > { %1990 = vsyncadd (!%p1663_p3), %s1344_s10, 4294967040  ;;  %p19_p7 = scmp.ge.s32.totalorder %s2155_s16, 5   ;;  %s2368_s18 = smov %s1997_s19 }
 0x37e   : > { %s2369_s19 = smov %s2001_s20  ;;  %s2370_s20 = smov %s2164_s27 }
 0x37f   : > { %s2371_s21 = smov %s2155_s16  ;;  %21 = sbr.rel (!%p19_p7) target bundleno = 6 (0x6), region = 93 }
 0x386   :  { %1349 = vsyncpa [#allocation3], 1 }
 0x387   :  { %1351 = vsyncpa [#allocation3 + $0x1], 1 }
 0x388   :  { %1352 = vsyncpa [#allocation6], 1 }
 0x389   :  { %1353 = vsyncpa [#allocation4], 1 }
 0x38a   :  { %1355 = vsyncpa [#allocation4 + $0x1], 1 }

// kernel: tpu_custom_call.1
= control target key start
LH: loop header
LB: loop body
LE: loop exit
PB: predicated region body
PF: predicated region fallthrough
CT: control target
= control target key end

     0   :  { %10 = vsyncpa [#allocation3], 0  ;;  %s2347_s0 = inlined_call_operand.hbm [shape: bf16[48,256], index: 0, kind: input, shape index: {}]   ;;  %s2348_s1 = inlined_call_operand.hbm [shape: bf16[256,128], index: 1, kind: input, shape index: {}]   ;;  %s2349_s2 = inlined_call_operand.vmem [shape: f32[1,128], index: 2, kind: input, shape index: {}]   ;;  %s2350_s3 = inlined_call_operand.hbm [shape: bf16[256,512], index: 3, kind: input, shape index: {}]   ;;  %s2351_s4 = inlined_call_operand.vmem [shape: f32[1,512], index: 4, kind: input, shape index: {}]   ;;  %s2352_s5 = inlined_call_operand.hbm [shape: f32[48,128], index: 5, kind: output, shape index: {}]  }
   0x1   :  { %12 = vsyncpa [#allocation3 + $0x1], 0 }
   0x2   :  { %13 = vsyncpa [#allocation6], 0 }
   0x3   :  { %14 = vsyncpa [#allocation4], 0 }
   0x4   :  { %16 = vsyncpa [#allocation4 + $0x1], 0  ;;  %s2053_s18 = smov 0   ;;  %s2055_s19 = smov 0  }
   0x5   :  { %s2057_s20 = smov 0   ;;  %s2059_s21 = smov 0  }
   0x6 LB: > { %s2074_s22 = sadd.s32 4294967295, %s2005_s21   ;;  %s1420_s23 = sadd.s32 4294967294, %s2005_s21   ;;  %s2005_s21 = sphi %s2059_s21, %s2371_s21   ;;  %s2001_s20 = sphi %s2057_s20, %s2370_s20   ;;  %s1997_s19 = sphi %s2055_s19, %s2369_s19   ;;  %s1993_s18 = sphi %s2053_s18, %s2368_s18  }
   0x7   : > { %p42_p0 = scmp.ne.s32.totalorder %s1997_s19, %s1993_s18  ;;  %p2353_p1 = scmp.eq.s32.totalorder %s2074_s22, 0 }
   0x8   : > { %p156_p3 = scmp.eq.s32.totalorder %s1420_s23, 2  ;;  %p1421_p5 = scmp.ge.s32.totalorder %s2005_s21, 1 }
   0x9   : > { %p2083_p4 = por %p2353_p1, %p42_p0  ;;  %p163_p7 = scmp.lt.s32.totalorder %s2005_s21, 4 }
   0xa   : > { %p2088_p6 = por %p156_p3, %p42_p0  ;;  %s2007_s27 = smov [#allocation5]  }
   0xb   : > { %s2356_s24 = scalar_select %p2083_p4, 1, 0 }
   0xc   : > { %s2357_s25 = scalar_select %p2088_p6, 1, 0 }
   0xd   : > { %p2093_p8 = pnand %p1421_p5, %p163_p7  ;;  %s175_s28 = sshll.u32 %s2007_s27, 4  ;;  %s176_s28 = int_to_ptr.vmem [resolvable:$true] %s175_s28 }
   0xe   : > { %s2008_s30 = smov [#allocation7]   ;;  %s1849_s9 = scalar_lea.hbm %s2348_s1, 2048 }
   0xf   : > { %s2358_s26 = scalar_select %p2093_p8, 1, 0 }
  0x10   : > { %p1651_p9 = pneg %p2093_p8  ;;  %s191_s6 = sshll.u32 %s2008_s30, 4  ;;  %s2105_s6 = int_to_ptr.vmem [resolvable:$true] %s191_s6 }
  0x11   : > { %p1850_p11 = scmp.ne.s32.totalorder %s2348_s1, %s1849_s9  ;;  %p1856_p3 = scmp.lt.u32.totalorder %s1849_s9, %s2348_s1 }
  0x12   : > { %p2101_p10 = pnand %p1651_p9, %p2353_p1 }
  0x14   : > { %p1851_p12 = pneg %p2101_p10 }
  0x16   : > { %p1852_p13 = pnand %p1851_p12, %p1850_p11 }
  0x18   : > { %p1853_p0 = pneg %p1852_p13 }
  0x1a   : > { %p1858_p5 = pnand %p1856_p3, %p1853_p0 }
  0x1c   : > { %1861 = shalt.err (!%p1858_p5)
}
  0x1d   : > { %s1862_s14 = scalar_lea.vmem %s176_s28, 2048  ;;  %p1870_p2 = scmp.lt.s32.totalorder %s176_s28, %s176_s28 }
  0x1e   : > { %p1863_p7 = scmp.ne.s32.totalorder %s176_s28, %s1862_s14  ;;  %p1871_p6 = scmp.lt.s32.totalorder %s1862_s14, %s1862_s14 }
  0x20   : > { %p1865_p9 = pnand %p1863_p7, %p1851_p12  ;;  %p1872_p4 = por %p1871_p6, %p1870_p2 }
  0x22   : > { %p1866_p1 = pneg %p1865_p9 }
  0x24   : > { %p1873_p8 = pnand %p1872_p4, %p1866_p1 }
  0x26   : > { %1876 = shalt.err (!%p1873_p8)
}
  0x27   : > { %s2009_s15 = smov 64   ;;  %s2010_s16 = smov 4  }
  0x28   : > { %1654 = dma.hbm_to_vmem [thread:$0]  (!%p2101_p10), %s2348_s1, 2048, %s176_s28, [#allocation6], %s2009_s15, %s2009_s15, %s2010_s16  }
  0x29   : > { %s1877_s7 = scalar_lea.hbm %s2350_s3, 8192 }
  0x2a   : > { %p1878_p11 = scmp.ne.s32.totalorder %s2350_s3, %s1877_s7  ;;  %p1884_p4 = scmp.lt.u32.totalorder %s1877_s7, %s2350_s3 }
  0x2c   : > { %p1880_p1 = pnand %p1878_p11, %p1851_p12 }
  0x2e   : > { %p1881_p2 = pneg %p1880_p1 }
  0x30   : > { %p1886_p6 = pnand %p1884_p4, %p1881_p2 }
  0x32   : > { %1889 = shalt.err (!%p1886_p6)
}
  0x33   : > { %s1890_s28 = scalar_lea.vmem %s2105_s6, 8192  ;;  %p1898_p3 = scmp.lt.s32.totalorder %s2105_s6, %s2105_s6 }
  0x34   : > { %p1891_p8 = scmp.ne.s32.totalorder %s2105_s6, %s1890_s28  ;;  %p1899_p5 = scmp.lt.s32.totalorder %s1890_s28, %s1890_s28 }
  0x36   : > { %p1893_p13 = pnand %p1891_p8, %p1851_p12  ;;  %p1900_p7 = por %p1899_p5, %p1898_p3 }
  0x38   : > { %p1894_p0 = pneg %p1893_p13 }
  0x3a   : > { %p1901_p9 = pnand %p1900_p7, %p1894_p0 }
  0x3c   : > { %1904 = shalt.err (!%p1901_p9)
}
  0x3d   : > { %s2011_s12 = smov 256   ;;  %s2012_s13 = smov 16  }
  0x3e   : > { %1657 = dma.hbm_to_vmem [thread:$0]  (!%p2101_p10), %s2350_s3, 8192, %s2105_s6, [#allocation6], %s2011_s12, %s2011_s12, %s2012_s13  }
  0x3f   : > { %s2155_s16 = sadd.s32 1, %s2005_s21   ;;  %s29_s23 = sadd.s32 1, %s2001_s20 }
  0x40   : > { %s26_s17 = ssub.s32 %s2005_s21, %s2155_s16  ;;  %p36_p11 = scmp.ne.s32.totalorder %s2001_s20, %s1997_s19 }
  0x41   : > { %p27_p12 = scmp.eq.s32.totalorder %s26_s17, 0  ;;  %p37_p1 = scmp.eq.s32.totalorder %s2005_s21, 0 }
  0x42   : > { %p2360_p4 = scmp.eq.s32.totalorder %s2074_s22, 2  ;;  %p1668_p8 = scmp.lt.s32.totalorder %s2005_s21, 3 }
  0x43   : > { %s2164_s27 = scalar_select %p27_p12, %s2001_s20, %s29_s23  }
  0x44   : > { %p38_p2 = por %p37_p1, %p36_p11  ;;  %p2168_p6 = por %p2360_p4, %p36_p11 }
  0x45   : > { %s208_s29 = sand.u32 1, %s2001_s20   ;;  %s1527_s6 = sshll.u32 %s2005_s21, 8 }
  0x46   : > { %s1425_s7 = sshll.u32 %s208_s29, 4  ;;  %s2178_s10 = scalar_lea.hbm %s2347_s0, %s1527_s6 }
  0x47   : > { %s212_s11 = scalar_lea.vmem [#allocation2], %s1425_s7  ;;  %p2182_p10 = pnand %p1668_p8, %p38_p2 }
  0x48   : > { %s220_s28 = sshll.u32 %s212_s11, 4  ;;  %s2186_s13 = scalar_lea.sflag [#allocation3], %s208_s29  ;;  %s2180_s28 = int_to_ptr.vmem [resolvable:$true] %s220_s28 }
  0x49   : > { %s1905_s14 = scalar_lea.hbm %s2178_s10, 256  ;;  %p1907_p0 = pneg %p2182_p10 }
  0x4a   : > { %p1906_p13 = scmp.ne.s32.totalorder %s2178_s10, %s1905_s14  ;;  %s1910_s23 = scalar_lea.hbm %s2347_s0, 768 }
  0x4b   : > { %p1911_p7 = scmp.lt.u32.totalorder %s2178_s10, %s2347_s0  ;;  %p1912_p9 = scmp.lt.u32.totalorder %s1910_s23, %s1905_s14 }
  0x4c   : > { %p1908_p3 = pnand %p1907_p0, %p1906_p13  ;;  %p1914_p11 = scmp.lt.u32.totalorder %s1905_s14, %s2178_s10 }
  0x4d   : > { %p1913_p12 = por %p1912_p9, %p1911_p7 }
  0x4e   : > { %p1909_p5 = pneg %p1908_p3 }
  0x4f   : > { %p1915_p1 = por %p1914_p11, %p1913_p12 }
  0x51   : > { %p1916_p2 = pnand %p1915_p1, %p1909_p5 }
  0x53   : > { %1919 = shalt.err (!%p1916_p2)
}
  0x54   : > { %s1920_s29 = scalar_lea.vmem %s2180_s28, 256  ;;  %s2013_s8 = smov [#allocation2]  }
  0x55   : > { %p1921_p4 = scmp.ne.s32.totalorder %s2180_s28, %s1920_s29  ;;  %s1925_s9 = sshll.u32 %s2013_s8, 4  ;;  %s1926_s9 = int_to_ptr.vmem [resolvable:$false] %s1925_s9 }
  0x56   : > { %s1927_s11 = scalar_lea.vmem %s1926_s9, 512  ;;  %p1928_p3 = scmp.lt.s32.totalorder %s2180_s28, %s1926_s9 }
  0x57   : > { %p1923_p8 = pnand %p1921_p4, %p1907_p0  ;;  %p1929_p7 = scmp.lt.s32.totalorder %s1927_s11, %s1920_s29 }
  0x59   : > { %p1924_p13 = pneg %p1923_p8  ;;  %p1930_p9 = por %p1929_p7, %p1928_p3 }
  0x5b   : > { %p1931_p12 = pnand %p1930_p9, %p1924_p13 }
  0x5d   : > { %1934 = shalt.err (!%p1931_p12)
}
  0x5e   : > { %s2014_s14 = smov 128   ;;  %s2015_s15 = smov 8  }
  0x5f   : > { %1661 = dma.hbm_to_vmem [thread:$0]  (!%p2182_p10), %s2178_s10, 256, %s2180_s28, %s2186_s13, %s2014_s14, %s2014_s14, %s2015_s15  }
  0x60   : > { %p2363_p0 = scmp.ne.s32.totalorder %s2358_s26, 0 }
  0x61   : > { %s2217_s17 = sand.u32 (!%p2363_p0), 1, %s1997_s19   ;;  %p2364_p5 = scmp.ne.s32.totalorder (!%p2363_p0), %s2356_s24, 0 }
  0x62   : > { %232 = sbr.rel (%p2363_p0) target bundleno = 887 (0x377), region = 40  ;;  %s1430_s23 = sshll.u32 (!%p2363_p0), %s2217_s17, 4 }
  0x63   : > { %s235_s7 = scalar_lea.sflag (!%p2363_p0), [#allocation3], %s2217_s17  ;;  %s2223_s6 = scalar_lea.vmem (!%p2363_p0), [#allocation2], %s1430_s23 }
  0x69   : > { %1980 = dma.done.wait (%p2364_p5), %s235_s7, 256  }
  0x6a   : > { %1982 = vsyncadd (%p2364_p5), %s235_s7, 4294967040  ;;  %p2365_p10 = scmp.eq.s32.totalorder %s2074_s22, 0 }
  0x6c   : > { %1984 = dma.done.wait (%p2365_p10), [#allocation6], 10240   ;;  %p2366_p11 = pmov %p2365_p10 }
  0x6d   : > { %v1726_v0 = vld [vmem:[#allocation5 + $0x40] sm:$0xff]   ;;  %v1730_v4 = vld [vmem:[#allocation5 + $0x48] sm:$0xff]   ;;  %v1734_v8 = vld [vmem:[#allocation5 + $0x50] sm:$0xff]   ;;  %s272_s14 = scalar_lea.vmem [#allocation8], %s1430_s23  ;;  %s1528_s7 = sshll.u32 %s2074_s22, 8 }
  0x6e   : > { %1986 = vsyncadd (%p2366_p11), [#allocation6], 4294957056  ;;  %v1727_v1 = vld [vmem:[#allocation7 + $0x100] ss:$16 sps:$4 sm:$0xff]   ;;  %1529 = vmatprep.subr.bf16.mxu0 %v1726_v0  ;;  %v1732_v6 = vld [vmem:[#allocation5 + $0x8] sm:$0xff]   ;;  %s1328_s15 = sshll.u32 %s272_s14, 4  ;;  %s2304_s26 = scalar_lea.hbm %s2352_s5, %s1528_s7  ;;  %s2298_s15 = int_to_ptr.vmem [resolvable:$true] %s1328_s15 }
  0x6f   : > { %v1728_v2 = vld [vmem:[#allocation5] sm:$0xff]   ;;  %1551 = vmatprep.subr.bf16.mxu1 %v1727_v1  ;;  %v1736_v10 = vld [vmem:[#allocation5 + $0x10] sm:$0xff]   ;;  %v1738_v12 = vld [vmem:[#allocation5 + $0x58] sm:$0xff]   ;;  %s1315_s23 = scalar_lea.sflag [#allocation4], %s2217_s17  ;;  %s1935_s10 = scalar_lea.vmem %s2298_s15, 256 }
  0x70   : > { %v1729_v3 = vld [vmem:[#allocation7] ss:$16 sps:$4 sm:$0xff]   ;;  %1530 = vmatpush3.bf16.msra.mxu0 %v1728_v2  ;;  %v1740_v14 = vld [vmem:[#allocation5 + $0x18] sm:$0xff]   ;;  %v1746_v20 = vld [vmem:[#allocation5 + $0x68] sm:$0xff]   ;;  %p1936_p1 = scmp.ne.s32.totalorder %s2298_s15, %s1935_s10  ;;  %s2020_s22 = smov [#allocation8]  }
  0x71   : > { %1552 = vmatpush3.bf16.msra.mxu1 %v1729_v3  ;;  %v1731_v5 = vld [vmem:[#allocation7 + $0x120] ss:$16 sps:$4 sm:$0xff]   ;;  %1531 = vmatprep.subr.bf16.mxu0 %v1730_v4  ;;  %v1748_v22 = vld [vmem:[#allocation5 + $0x28] sm:$0xff]   ;;  %v1754_v28 = vld [vmem:[#allocation5 + $0x78] sm:$0xff]   ;;  %s1939_s28 = sshll.u32 %s2020_s22, 4  ;;  %s1940_s28 = int_to_ptr.vmem [resolvable:$false] %s1939_s28 }
  0x72   : > { %1553 = vmatprep.subr.bf16.mxu1 %v1731_v5  ;;  %v1733_v7 = vld [vmem:[#allocation7 + $0x20] ss:$16 sps:$4 sm:$0xff]   ;;  %v1756_v30 = vld [vmem:[#allocation5 + $0x38] sm:$0xff]   ;;  %v1761_v34 = vld [vmem:[#allocation7 + $0x104] ss:$16 sps:$4 sm:$0xff]   ;;  %p1937_p2 = pnand %p1936_p1, %p2168_p6  ;;  %s1941_s12 = scalar_lea.vmem %s1940_s28, 512 }
  0x73   : > { %v1735_v9 = vld [vmem:[#allocation7 + $0x140] ss:$16 sps:$4 sm:$0xff]   ;;  %v2234_v32 = vld [vmem:[%s2223_s6 + $0x4] ss:$8 sps:$4 sm:$0xff]   ;;  %v1764_v37 = vld [vmem:[#allocation7 + $0x108] ss:$16 sps:$4 sm:$0xff]   ;;  %p1942_p8 = scmp.lt.s32.totalorder %s2298_s15, %s1940_s28  ;;  %p1943_p13 = scmp.lt.s32.totalorder %s1941_s12, %s1935_s10 }
  0x74   : > { %1532 = vmatpush3.bf16.msra.mxu0 %v1732_v6  ;;  %v1737_v11 = vld [vmem:[#allocation7 + $0x40] ss:$16 sps:$4 sm:$0xff]   ;;  %455 = vmatprep.mubr.bf16.mxu0 %v2234_v32  ;;  %v1762_v35 = vld [vmem:[#allocation7 + $0x4] ss:$16 sps:$4 sm:$0xff]   ;;  %v1766_v39 = vld [vmem:[#allocation7 + $0x8] ss:$16 sps:$4 sm:$0xff]   ;;  %p1938_p4 = pneg %p1937_p2 }
  0x75   : > { %1554 = vmatpush3.bf16.msra.mxu1 %v1733_v7  ;;  %1533 = vmatprep.subr.bf16.mxu0 %v1734_v8  ;;  %v1739_v13 = vld [vmem:[#allocation7 + $0x160] ss:$16 sps:$4 sm:$0xff]   ;;  %v1763_v36 = vld [vmem:[#allocation7 + $0x124] ss:$16 sps:$4 sm:$0xff]   ;;  %v1768_v41 = vld [vmem:[#allocation7 + $0x128] ss:$16 sps:$4 sm:$0xff]   ;;  %p1944_p3 = por %p1943_p13, %p1942_p8 }
  0x76   : > { %1555 = vmatprep.subr.bf16.mxu1 %v1735_v9  ;;  %v1741_v15 = vld [vmem:[#allocation7 + $0x60] ss:$16 sps:$4 sm:$0xff]   ;;  %649 = vmatprep.mubr.bf16.mxu1 %v2234_v32  ;;  %v1765_v38 = vld [vmem:[#allocation7 + $0x24] ss:$16 sps:$4 sm:$0xff]   ;;  %v1770_v43 = vld [vmem:[#allocation7 + $0x28] ss:$16 sps:$4 sm:$0xff]  }
  0x77   : > { %v1742_v16 = vld [vmem:[#allocation5 + $0x60] sm:$0xff]   ;;  %v1750_v24 = vld [vmem:[#allocation5 + $0x70] sm:$0xff]   ;;  %v1772_v45 = vld [vmem:[#allocation7 + $0x148] ss:$16 sps:$4 sm:$0xff]   ;;  %p1945_p7 = pnand %p1944_p3, %p1938_p4 }
  0x78   : > { %1534 = vmatpush3.bf16.msra.mxu0 %v1736_v10  ;;  %v1743_v17 = vld [vmem:[#allocation7 + $0x180] ss:$16 sps:$4 sm:$0xff]   ;;  %v1767_v40 = vld [vmem:[#allocation7 + $0x144] ss:$16 sps:$4 sm:$0xff]   ;;  %v1774_v47 = vld [vmem:[#allocation7 + $0x48] ss:$16 sps:$4 sm:$0xff]  }
  0x79   : > { %1556 = vmatpush3.bf16.msra.mxu1 %v1737_v11  ;;  %1535 = vmatprep.subr.bf16.mxu0 %v1738_v12  ;;  %v1744_v18 = vld [vmem:[#allocation5 + $0x20] sm:$0xff]   ;;  %v1752_v26 = vld [vmem:[#allocation5 + $0x30] sm:$0xff]   ;;  %v1776_v49 = vld [vmem:[#allocation7 + $0x168] ss:$16 sps:$4 sm:$0xff]  }
  0x7a   : > { %1557 = vmatprep.subr.bf16.mxu1 %v1739_v13  ;;  %v1745_v19 = vld [vmem:[#allocation7 + $0x80] ss:$16 sps:$4 sm:$0xff]   ;;  %v1769_v42 = vld [vmem:[#allocation7 + $0x44] ss:$16 sps:$4 sm:$0xff]   ;;  %v1778_v51 = vld [vmem:[#allocation7 + $0x68] ss:$16 sps:$4 sm:$0xff]  }
  0x7b   : > { %v1747_v21 = vld [vmem:[#allocation7 + $0x1a0] ss:$16 sps:$4 sm:$0xff]   ;;  %v1771_v44 = vld [vmem:[#allocation7 + $0x164] ss:$16 sps:$4 sm:$0xff]   ;;  %v1780_v53 = vld [vmem:[#allocation7 + $0x188] ss:$16 sps:$4 sm:$0xff]  }
  0x7c   : > { %1536 = vmatpush3.bf16.msra.mxu0 %v1740_v14  ;;  %v1749_v23 = vld [vmem:[#allocation7 + $0xa0] ss:$16 sps:$4 sm:$0xff]   ;;  %v1773_v46 = vld [vmem:[#allocation7 + $0x64] ss:$16 sps:$4 sm:$0xff]   ;;  %v1782_v55 = vld [vmem:[#allocation7 + $0x88] ss:$16 sps:$4 sm:$0xff]  }
  0x7d   : > { %1558 = vmatpush3.bf16.msra.mxu1 %v1741_v15  ;;  %1537 = vmatprep.subr.bf16.mxu0 %v1742_v16  ;;  %v1751_v25 = vld [vmem:[#allocation7 + $0x1c0] ss:$16 sps:$4 sm:$0xff]   ;;  %v1775_v48 = vld [vmem:[#allocation7 + $0x184] ss:$16 sps:$4 sm:$0xff]   ;;  %v1784_v57 = vld [vmem:[#allocation7 + $0x1a8] ss:$16 sps:$4 sm:$0xff]  }
  0x7e   : > { %1559 = vmatprep.subr.bf16.mxu1 %v1743_v17  ;;  %v1753_v27 = vld [vmem:[#allocation7 + $0xc0] ss:$16 sps:$4 sm:$0xff]   ;;  %v1777_v50 = vld [vmem:[#allocation7 + $0x84] ss:$16 sps:$4 sm:$0xff]   ;;  %v1786_v59 = vld [vmem:[#allocation7 + $0xa8] ss:$16 sps:$4 sm:$0xff]  }
  0x7f   : > { %v1755_v29 = vld [vmem:[#allocation7 + $0x1e0] ss:$16 sps:$4 sm:$0xff]   ;;  %v1779_v52 = vld [vmem:[#allocation7 + $0x1a4] ss:$16 sps:$4 sm:$0xff]   ;;  %v1788_v61 = vld [vmem:[#allocation7 + $0x1c8] ss:$16 sps:$4 sm:$0xff]  }
  0x80   : > { %1538 = vmatpush3.bf16.msra.mxu0 %v1744_v18  ;;  %v1757_v31 = vld [vmem:[#allocation7 + $0xe0] ss:$16 sps:$4 sm:$0xff]   ;;  %v1781_v54 = vld [vmem:[#allocation7 + $0xa4] ss:$16 sps:$4 sm:$0xff]   ;;  %v1790_v63 = vld [vmem:[#allocation7 + $0xc8] ss:$16 sps:$4 sm:$0xff]  }
  0x81   : > { %1560 = vmatpush3.bf16.msra.mxu1 %v1745_v19  ;;  %1539 = vmatprep.subr.bf16.mxu0 %v1746_v20  ;;  %v2237_v33 = vld [vmem:[%s2223_s6] ss:$8 sps:$4 sm:$0xff]   ;;  %v1783_v56 = vld [vmem:[#allocation7 + $0x1c4] ss:$16 sps:$4 sm:$0xff]   ;;  %v1792_v1 = vld [vmem:[#allocation7 + $0x10c] ss:$16 sps:$4 sm:$0xff]  }
  0x82   : > { %1561 = vmatprep.subr.bf16.mxu1 %v1747_v21  ;;  %v1785_v58 = vld [vmem:[#allocation7 + $0xc4] ss:$16 sps:$4 sm:$0xff]   ;;  %v1791_v0 = vld [vmem:[#allocation7 + $0x1e8] ss:$16 sps:$4 sm:$0xff]   ;;  %v1794_v3 = vld [vmem:[#allocation7 + $0xc] ss:$16 sps:$4 sm:$0xff]  }
  0x83   : > { %v1787_v60 = vld [vmem:[#allocation7 + $0x1e4] ss:$16 sps:$4 sm:$0xff]   ;;  %v1793_v2 = vld [vmem:[#allocation7 + $0xe8] ss:$16 sps:$4 sm:$0xff]   ;;  %v1795_v4 = vld [vmem:[#allocation7 + $0x12c] ss:$16 sps:$4 sm:$0xff]  }
  0x84   : > { %1540 = vmatpush3.bf16.msra.mxu0 %v1748_v22  ;;  %v1789_v62 = vld [vmem:[#allocation7 + $0xe4] ss:$16 sps:$4 sm:$0xff]   ;;  %v1796_v5 = vld [vmem:[#allocation7 + $0x2c] ss:$16 sps:$4 sm:$0xff]   ;;  %v1434_v21 = vld [vmem:[%s2349_s2] ss:$0 sm:$0xff] }
  0x85   : > { %1562 = vmatpush3.bf16.msra.mxu1 %v1749_v23  ;;  %1541 = vmatprep.subr.bf16.mxu0 %v1750_v24  ;;  %v1797_v6 = vld [vmem:[#allocation7 + $0x14c] ss:$16 sps:$4 sm:$0xff]  }
  0x86   : > { %1563 = vmatprep.subr.bf16.mxu1 %v1751_v25  ;;  %v1798_v7 = vld [vmem:[#allocation7 + $0x4c] ss:$16 sps:$4 sm:$0xff]   ;;  %v1453_v25 = vld [vmem:[%s2351_s4] ss:$0 sm:$0xff] }
  0x87   : > { %v1799_v8 = vld [vmem:[#allocation7 + $0x16c] ss:$16 sps:$4 sm:$0xff]  }
  0x88   : > { %1542 = vmatpush3.bf16.msra.mxu0 %v1752_v26  ;;  %v1800_v9 = vld [vmem:[#allocation7 + $0x6c] ss:$16 sps:$4 sm:$0xff]  }
  0x89   : > { %1564 = vmatpush3.bf16.msra.mxu1 %v1753_v27  ;;  %1543 = vmatprep.subr.bf16.mxu0 %v1754_v28  ;;  %v1801_v10 = vld [vmem:[#allocation7 + $0x18c] ss:$16 sps:$4 sm:$0xff]  }
  0x8a   : > { %1565 = vmatprep.subr.bf16.mxu1 %v1755_v29  ;;  %v1802_v11 = vld [vmem:[#allocation7 + $0x8c] ss:$16 sps:$4 sm:$0xff]  }
  0x8b   : > { %v1803_v12 = vld [vmem:[#allocation7 + $0x1ac] ss:$16 sps:$4 sm:$0xff]  }
  0x8c   : > { %1544 = vmatpush3.bf16.msra.mxu0 %v1756_v30  ;;  %v1804_v13 = vld [vmem:[#allocation7 + $0xac] ss:$16 sps:$4 sm:$0xff]  }
  0x8d   : > { %1566 = vmatpush3.bf16.msra.mxu1 %v1757_v31  ;;  %1573 = vmatprep.subr.bf16.mxu0 %v1761_v34  ;;  %v1805_v14 = vld [vmem:[#allocation7 + $0x1cc] ss:$16 sps:$4 sm:$0xff]  }
  0x8e   : > { %1595 = vmatprep.subr.bf16.mxu1 %v1764_v37  ;;  %v1806_v15 = vld [vmem:[#allocation7 + $0xcc] ss:$16 sps:$4 sm:$0xff]  }
  0x8f   : > { %456 = vmatmul.mubr.bf16.vlgmr.msra.gmra.mrb[0].mxu0 %v2237_v33  ;;  %v1807_v16 = vld [vmem:[#allocation7 + $0x1ec] ss:$16 sps:$4 sm:$0xff]  }
  0x90   : > { %650 = vmatmul.mubr.bf16.vlgmr.msra.gmra.mrb[0].mxu1 %v2237_v33  ;;  %1574 = vmatpush3.bf16.msra.mxu0 %v1762_v35  ;;  %v1808_v17 = vld [vmem:[#allocation7 + $0xec] ss:$16 sps:$4 sm:$0xff]  }
  0x91   : > { %855 = vmatprep.mubr.bf16.mxu0 %v2234_v32  ;;  %1575 = vmatprep.subr.bf16.mxu0 %v1763_v36 }
  0x92   : > { %1063 = vmatprep.mubr.bf16.mxu1 %v2234_v32  ;;  %1596 = vmatpush3.bf16.msra.mxu1 %v1766_v39 }
  0x93   : > { %1597 = vmatprep.subr.bf16.mxu1 %v1768_v41 }
  0x94   : > { %1576 = vmatpush3.bf16.msra.mxu0 %v1765_v38  ;;  %v1470_v38 = vld [vmem:[%s2351_s4 + $0x1] ss:$0 sm:$0xff] }
  0x95   : > { %1577 = vmatprep.subr.bf16.mxu0 %v1767_v40 }
  0x96   : > { %1598 = vmatpush3.bf16.msra.mxu1 %v1770_v43 }
  0x97   : > { %1599 = vmatprep.subr.bf16.mxu1 %v1772_v45 }
  0x98   : > { %1578 = vmatpush3.bf16.msra.mxu0 %v1769_v42 }
  0x99   : > { %1579 = vmatprep.subr.bf16.mxu0 %v1771_v44 }
  0x9a   : > { %1600 = vmatpush3.bf16.msra.mxu1 %v1774_v47 }
  0x9b   : > { %1601 = vmatprep.subr.bf16.mxu1 %v1776_v49 }
  0x9c   : > { %1580 = vmatpush3.bf16.msra.mxu0 %v1773_v46  ;;  %v1487_v46 = vld [vmem:[%s2351_s4 + $0x2] ss:$0 sm:$0xff] }
  0x9d   : > { %1581 = vmatprep.subr.bf16.mxu0 %v1775_v48 }
  0x9e   : > { %1602 = vmatpush3.bf16.msra.mxu1 %v1778_v51 }
  0x9f   : > { %1603 = vmatprep.subr.bf16.mxu1 %v1780_v53 }
  0xa0   : > { %1582 = vmatpush3.bf16.msra.mxu0 %v1777_v50 }
  0xa1   : > { %1583 = vmatprep.subr.bf16.mxu0 %v1779_v52 }
  0xa2   : > { %1604 = vmatpush3.bf16.msra.mxu1 %v1782_v55 }
  0xa3   : > { %1605 = vmatprep.subr.bf16.mxu1 %v1784_v57 }
  0xa4   : > { %1584 = vmatpush3.bf16.msra.mxu0 %v1781_v54 }
  0xa5   : > { %1585 = vmatprep.subr.bf16.mxu0 %v1783_v56  ;;  %v1504_v56 = vld [vmem:[%s2351_s4 + $0x3] ss:$0 sm:$0xff] }
  0xa6   : > { %1606 = vmatpush3.bf16.msra.mxu1 %v1786_v59 }
  0xa7   : > { %1607 = vmatprep.subr.bf16.mxu1 %v1788_v61 }
  0xa8   : > { %1586 = vmatpush3.bf16.msra.mxu0 %v1785_v58 }
  0xa9   : > { %1587 = vmatprep.subr.bf16.mxu0 %v1787_v60 }
  0xaa   : > { %1608 = vmatpush3.bf16.msra.mxu1 %v1790_v63 }
  0xab   : > { %1609 = vmatprep.subr.bf16.mxu1 %v1791_v0 }
  0xac   : > { %1588 = vmatpush3.bf16.msra.mxu0 %v1789_v62 }
  0xad   : > { %1617 = vmatprep.subr.bf16.mxu0 %v1792_v1 }
  0xae   : > { %1610 = vmatpush3.bf16.msra.mxu1 %v1793_v2 }
  0xaf   : > { %856 = vmatmul.mubr.bf16.vlgmr.msra.gmra.mrb[4].mxu0 %v2237_v33 }
  0xb0   : > { %1618 = vmatpush3.bf16.msra.mxu0 %v1794_v3  ;;  %1271 = vmatprep.mubr.bf16.mxu0 %v2234_v32 }
  0xb1   : > { %1619 = vmatprep.subr.bf16.mxu0 %v1795_v4  ;;  %1064 = vmatmul.mubr.bf16.vlgmr.msra.gmra.mrb[4].mxu1 %v2237_v33 }
  0xb4   : > { %1620 = vmatpush3.bf16.msra.mxu0 %v1796_v5 }
  0xb5   : > { %1621 = vmatprep.subr.bf16.mxu0 %v1797_v6 }
  0xb8   : > { %1622 = vmatpush3.bf16.msra.mxu0 %v1798_v7 }
  0xb9   : > { %1623 = vmatprep.subr.bf16.mxu0 %v1799_v8 }
  0xbc   : > { %1624 = vmatpush3.bf16.msra.mxu0 %v1800_v9 }
  0xbd   : > { %1625 = vmatprep.subr.bf16.mxu0 %v1801_v10 }
  0xc0   : > { %1626 = vmatpush3.bf16.msra.mxu0 %v1802_v11 }
  0xc1   : > { %1627 = vmatprep.subr.bf16.mxu0 %v1803_v12 }
  0xc4   : > { %1628 = vmatpush3.bf16.msra.mxu0 %v1804_v13 }
  0xc5   : > { %1629 = vmatprep.subr.bf16.mxu0 %v1805_v14 }
  0xc8   : > { %1630 = vmatpush3.bf16.msra.mxu0 %v1806_v15 }
  0xc9   : > { %1631 = vmatprep.subr.bf16.mxu0 %v1807_v16 }
  0xcc   : > { %1632 = vmatpush3.bf16.msra.mxu0 %v1808_v17 }
  0xcf   : > { %1272 = vmatmul.mubr.bf16.vlgmr.msra.gmra.mrb[8].mxu0 %v2237_v33 }
 0x162   : > { %v1545_v18 = vpop.f32.mrb[0].mxu0 }
 0x163   : > { %v1567_v19 = vpop.f32.mrb[0].mxu1  ;;  %v1546_v20 = vpop.f32.mrb[1].mxu0 }
 0x164   : > { %v1547_v22 = vadd.f32 %v1546_v20, %v1545_v18  ;;  %v1568_v23 = vpop.f32.mrb[1].mxu1  ;;  %v1548_v24 = vpop.f32.mrb[2].mxu0 }
 0x165   : > { %v1569_v26 = vadd.f32 %v1568_v23, %v1567_v19  ;;  %v1549_v27 = vpop.f32.mrb[3].mxu0  ;;  %v1570_v28 = vpop.f32.mrb[2].mxu1 }
 0x166   : > { %v1550_v29 = vadd.f32 %v1549_v27, %v1548_v24  ;;  %v1571_v30 = vpop.f32.mrb[3].mxu1  ;;  %v458_v31 = vadd.f32 %v1547_v22, %v1434_v21  ;;  %v2016_v27 = vmov 0  }
 0x167   : > { %v1572_v32 = vadd.f32 %v1571_v30, %v1570_v28  ;;  %v652_v33 = vadd.f32 %v1569_v26, %v1453_v25  ;;  %1718 = vset.pattern.permute.xlu0 %v2016_v27  ;;  %1719 = vset.pattern.permute.xlu1 %v2016_v27 }
 0x168   : > { %464 = vmax.xlane.f32.xlu0 %v458_v31  ;;  %v461_v35 = vadd.f32 %v1550_v29, %v1434_v21 }
 0x169   : > { %658 = vmax.xlane.f32.xlu1 %v652_v33  ;;  %v655_v34 = vadd.f32 %v1572_v32, %v1453_v25 }
 0x16c   : > { %466 = vmax.xlane.f32.xlu0 %v461_v35 }
 0x16d   : > { %660 = vmax.xlane.f32.xlu1 %v655_v34 }
 0x182   : > { %v1589_v36 = vpop.f32.mrb[4].mxu0 }
 0x183   : > { %v1590_v37 = vpop.f32.mrb[5].mxu0 }
 0x184   : > { %v1591_v39 = vadd.f32 %v1590_v37, %v1589_v36  ;;  %v1592_v40 = vpop.f32.mrb[6].mxu0  ;;  %v1611_v43 = vpop.f32.mrb[4].mxu1 }
 0x185   : > { %v1593_v41 = vpop.f32.mrb[7].mxu0  ;;  %v1612_v45 = vpop.f32.mrb[5].mxu1 }
 0x186   : > { %v1594_v42 = vadd.f32 %v1593_v41, %v1592_v40  ;;  %v858_v44 = vadd.f32 %v1591_v39, %v1470_v38  ;;  %v1613_v47 = vadd.f32 %v1612_v45, %v1611_v43  ;;  %v1614_v48 = vpop.f32.mrb[6].mxu1 }
 0x187   : > { %v1615_v50 = vpop.f32.mrb[7].mxu1 }
 0x188   : > { %864 = vmax.xlane.f32.xlu0 %v858_v44  ;;  %v861_v49 = vadd.f32 %v1594_v42, %v1470_v38  ;;  %v1616_v51 = vadd.f32 %v1615_v50, %v1614_v48  ;;  %v1066_v52 = vadd.f32 %v1613_v47, %v1487_v46 }
 0x18a   : > { %866 = vmax.xlane.f32.xlu1 %v861_v49  ;;  %v1069_v53 = vadd.f32 %v1616_v51, %v1487_v46 }
 0x18c   : > { %1072 = vmax.xlane.f32.xlu0 %v1066_v52 }
 0x18e   : > { %1074 = vmax.xlane.f32.xlu1 %v1069_v53 }
 0x1a2   : > { %v1633_v54 = vpop.f32.mrb[8].mxu0 }
 0x1a3   : > { %v1634_v55 = vpop.f32.mrb[9].mxu0 }
 0x1a4   : > { %v1635_v57 = vadd.f32 %v1634_v55, %v1633_v54  ;;  %v1636_v58 = vpop.f32.mrb[10].mxu0 }
 0x1a5   : > { %v1637_v59 = vpop.f32.mrb[11].mxu0 }
 0x1a6   : > { %v1638_v60 = vadd.f32 %v1637_v59, %v1636_v58  ;;  %v1274_v61 = vadd.f32 %v1635_v57, %v1504_v56 }
 0x1a8   : > { %1280 = vmax.xlane.f32.xlu0 %v1274_v61  ;;  %v1277_v62 = vadd.f32 %v1638_v60, %v1504_v56 }
 0x1aa   : > { %1282 = vmax.xlane.f32.xlu1 %v1277_v62 }
 0x1f5   : > { %v465_v63 = vpop.xlane.xlu0 %464 }
 0x1f6   : > { %v659_v0 = vpop.xlane.xlu1 %658  ;;  %v468_v1 = vsub.f32 %v458_v31, %v465_v63 }
 0x1f7   : > { %v662_v2 = vsub.f32 %v652_v33, %v659_v0 }
 0x1f8   : > { %v470_v3 = vmul.f32 1.442695, %v468_v1 }
 0x1f9   : > { %v664_v4 = vmul.f32 1.442695, %v662_v2  ;;  %v467_v5 = vpop.xlane.xlu0 %466 }
 0x1fa   : > { %1809 = vpow2.f32 %v470_v3  ;;  %v661_v6 = vpop.xlane.xlu1 %660  ;;  %v469_v7 = vsub.f32 %v461_v35, %v467_v5 }
 0x1fb   : > { %v663_v8 = vsub.f32 %v655_v34, %v661_v6  ;;  %1811 = vpow2.f32 %v664_v4 }
 0x1fc   : > { %v472_v9 = vmul.f32 1.442695, %v469_v7 }
 0x1fd   : > { %v666_v10 = vmul.f32 1.442695, %v663_v8 }
 0x1fe   : > { %1813 = vpow2.f32 %v472_v9 }
 0x1ff   : > { %1815 = vpow2.f32 %v666_v10 }
 0x204   : > { %v1810_v11 = vpop.eup %1809 }
 0x205   : > { %474 = vadd.xlane.f32.xlu0 %v1810_v11  ;;  %v2264_v12 = vpop.eup %1811 }
 0x208   : > { %v1814_v13 = vpop.eup %1813 }
 0x209   : > { %668 = vadd.xlane.f32.xlu0 %v2264_v12  ;;  %476 = vadd.xlane.f32.xlu1 %v1814_v13  ;;  %v2267_v14 = vpop.eup %1815 }
 0x20d   : > { %670 = vadd.xlane.f32.xlu1 %v2267_v14 }
 0x215   : > { %v865_v15 = vpop.xlane.xlu0 %864 }
 0x216   : > { %v868_v16 = vsub.f32 %v858_v44, %v865_v15 }
 0x217   : > { %v867_v17 = vpop.xlane.xlu1 %866 }
 0x218   : > { %v870_v18 = vmul.f32 1.442695, %v868_v16  ;;  %v869_v19 = vsub.f32 %v861_v49, %v867_v17 }
 0x219   : > { %v1073_v20 = vpop.xlane.xlu0 %1072 }
 0x21a   : > { %1817 = vpow2.f32 %v870_v18  ;;  %v872_v21 = vmul.f32 1.442695, %v869_v19  ;;  %v1076_v22 = vsub.f32 %v1066_v52, %v1073_v20  ;;  %v2017_v52 = vmov 3  }
 0x21b   : > { %v1075_v23 = vpop.xlane.xlu1 %1074 }
 0x21c   : > { %1819 = vpow2.f32 %v872_v21  ;;  %v1078_v24 = vmul.f32 1.442695, %v1076_v22  ;;  %v1077_v25 = vsub.f32 %v1069_v53, %v1075_v23  ;;  %v2018_v53 = vmov 1  }
 0x21e   : > { %1821 = vpow2.f32 %v1078_v24  ;;  %v1080_v26 = vmul.f32 1.442695, %v1077_v25 }
 0x220   : > { %1823 = vpow2.f32 %v1080_v26 }
 0x224   : > { %v2270_v28 = vpop.eup %1817 }
 0x225   : > { %874 = vadd.xlane.f32.xlu0 %v2270_v28 }
 0x226   : > { %v2273_v29 = vpop.eup %1819 }
 0x227   : > { %876 = vadd.xlane.f32.xlu1 %v2273_v29 }
 0x228   : > { %v2276_v30 = vpop.eup %1821 }
 0x229   : > { %1082 = vadd.xlane.f32.xlu0 %v2276_v30 }
 0x22a   : > { %v2279_v31 = vpop.eup %1823 }
 0x22b   : > { %1084 = vadd.xlane.f32.xlu1 %v2279_v31 }
 0x235   : > { %v1281_v32 = vpop.xlane.xlu0 %1280 }
 0x236   : > { %v1284_v33 = vsub.f32 %v1274_v61, %v1281_v32 }
 0x237   : > { %v1283_v34 = vpop.xlane.xlu1 %1282 }
 0x238   : > { %v1286_v35 = vmul.f32 1.442695, %v1284_v33  ;;  %v1285_v36 = vsub.f32 %v1277_v62, %v1283_v34  ;;  %v2019_v62 = vmov 2  }
 0x23a   : > { %1825 = vpow2.f32 %v1286_v35  ;;  %v1288_v37 = vmul.f32 1.442695, %v1285_v36 }
 0x23c   : > { %1827 = vpow2.f32 %v1288_v37 }
 0x244   : > { %v2282_v38 = vpop.eup %1825 }
 0x245   : > { %1290 = vadd.xlane.f32.xlu0 %v2282_v38 }
 0x246   : > { %v2285_v39 = vpop.eup %1827 }
 0x247   : > { %1292 = vadd.xlane.f32.xlu1 %v2285_v39 }
 0x292   : > { %v475_v40 = vpop.xlane.xlu0 %474 }
 0x293   : > { %1829 = vrcp.f32 %v475_v40 }
 0x296   : > { %v477_v41 = vpop.xlane.xlu1 %476  ;;  %v669_v42 = vpop.xlane.xlu0 %668 }
 0x297   : > { %1831 = vrcp.f32 %v477_v41 }
 0x298   : > { %1833 = vrcp.f32 %v669_v42 }
 0x29a   : > { %v671_v43 = vpop.xlane.xlu1 %670 }
 0x29b   : > { %1835 = vrcp.f32 %v671_v43 }
 0x29d   : > { %v1830_v44 = vpop.eup %1829 }
 0x29e   : > { %v480_v46 = vmul.f32 %v1830_v44, %v1810_v11 }
 0x2a1   : > { %v1832_v45 = vpop.eup %1831 }
 0x2a2   : > { %v1834_v47 = vpop.eup %1833  ;;  %v481_v49 = vmul.f32 %v1832_v45, %v1814_v13 }
 0x2a3   : > { %v674_v48 = vmul.f32 %v1834_v47, %v480_v46 }
 0x2a5   : > { %v1836_v50 = vpop.eup %1835  ;;  %678 = vperm.xlu0 %1718, %v674_v48  }
 0x2a6   : > { %v675_v51 = vmul.f32 %v1836_v50, %v481_v49 }
 0x2a8   : > { %683 = vperm.xlu1 %1719, %v675_v51  }
 0x2a9   : > { %1725 = vset.pattern.permute.xlu0 %v2017_v52 }
 0x2ac   : > { %1720 = vset.pattern.permute.xlu1 %v2018_v53 }
 0x2b2   : > { %v875_v54 = vpop.xlane.xlu0 %874 }
 0x2b3   : > { %1837 = vrcp.f32 %v875_v54 }
 0x2b4   : > { %v877_v56 = vpop.xlane.xlu1 %876 }
 0x2b6   : > { %v1083_v55 = vpop.xlane.xlu0 %1082 }
 0x2b7   : > { %1839 = vrcp.f32 %v1083_v55 }
 0x2b8   : > { %1841 = vrcp.f32 %v877_v56  ;;  %v1085_v58 = vpop.xlane.xlu1 %1084 }
 0x2b9   : > { %1843 = vrcp.f32 %v1085_v58 }
 0x2bd   : > { %v1838_v57 = vpop.eup %1837 }
 0x2be   : > { %v880_v59 = vmul.f32 %v1838_v57, %v480_v46 }
 0x2c0   : > { %884 = vperm.xlu1 %1720, %v880_v59  }
 0x2c1   : > { %v1840_v60 = vpop.eup %1839 }
 0x2c2   : > { %v1088_v61 = vmul.f32 %v1840_v60, %v480_v46  ;;  %v1842_v63 = vpop.eup %1841 }
 0x2c3   : > { %v881_v0 = vmul.f32 %v1842_v63, %v481_v49  ;;  %v1844_v1 = vpop.eup %1843 }
 0x2c4   : > { %1721 = vset.pattern.permute.xlu1 %v2019_v62  ;;  %v1089_v2 = vmul.f32 %v1844_v1, %v481_v49 }
 0x2c5   : > { %1092 = vperm.xlu1 %1721, %v1088_v61  }
 0x2c9   : > { %1722 = vset.pattern.permute.xlu1 %v2018_v53 }
 0x2ca   : > { %889 = vperm.xlu1 %1722, %v881_v0  }
 0x2ce   : > { %1723 = vset.pattern.permute.xlu1 %v2019_v62 }
 0x2cf   : > { %1097 = vperm.xlu1 %1723, %v1089_v2  }
 0x2d2   : > { %v1291_v3 = vpop.xlane.xlu0 %1290 }
 0x2d3   : > { %1845 = vrcp.f32 %v1291_v3  ;;  %1724 = vset.pattern.permute.xlu1 %v2017_v52 }
 0x2d4   : > { %v1293_v4 = vpop.xlane.xlu1 %1292 }
 0x2d5   : > { %1847 = vrcp.f32 %v1293_v4 }
 0x2dd   : > { %v1846_v5 = vpop.eup %1845 }
 0x2de   : > { %v1296_v6 = vmul.f32 %v1846_v5, %v480_v46 }
 0x2df   : > { %v1848_v7 = vpop.eup %1847 }
 0x2e0   : > { %1300 = vperm.xlu1 %1724, %v1296_v6   ;;  %v1297_v8 = vmul.f32 %v1848_v7, %v481_v49 }
 0x2e4   : > { %1305 = vperm.xlu1 %1724, %v1297_v8  }
 0x324   : > { %v679_v15 = vpop.permute.xlu0 %678 }
 0x325   : > { %v686_v18 = vmul.f32 %v2264_v12, %v679_v15 }
 0x327   : > { %v684_v9 = vpop.permute.xlu1 %683 }
 0x328   : > { %v687_v23 = vmul.f32 %v2267_v14, %v684_v9 }
 0x33f   : > { %v885_v10 = vpop.permute.xlu1 %884 }
 0x340   : > { %v892_v16 = vmul.f32 %v2270_v28, %v885_v10 }
 0x342   : > { %v894_v20 = vadd.f32 %v892_v16, %v686_v18 }
 0x344   : > { %v1093_v11 = vpop.permute.xlu1 %1092 }
 0x345   : > { %v1100_v19 = vmul.f32 %v2276_v30, %v1093_v11 }
 0x347   : > { %v1102_v24 = vadd.f32 %v1100_v19, %v894_v20 }
 0x349   : > { %v890_v13 = vpop.permute.xlu1 %889 }
 0x34a   : > { %v893_v21 = vmul.f32 %v2273_v29, %v890_v13 }
 0x34c   : > { %v895_v27 = vadd.f32 %v893_v21, %v687_v23 }
 0x34e   : > { %v1098_v17 = vpop.permute.xlu1 %1097 }
 0x34f   : > { %v1101_v25 = vmul.f32 %v2279_v31, %v1098_v17 }
 0x351   : > { %v1103_v30 = vadd.f32 %v1101_v25, %v895_v27 }
 0x35f   : > { %v1301_v22 = vpop.permute.xlu1 %1300 }
 0x360   : > { %v1308_v26 = vmul.f32 %v2282_v38, %v1301_v22 }
 0x362   : > { %v1310_v12 = vadd.f32 %v1308_v26, %v1102_v24 }
 0x363   : > { %v1306_v28 = vpop.permute.xlu1 %1305 }
 0x364   : > { %1312 = vst [vmem:[%s272_s14] sm:$0xff] %v1310_v12  ;;  %v1309_v14 = vmul.f32 %v2285_v39, %v1306_v28 }
 0x366   : > { %v1311_v29 = vadd.f32 %v1309_v14, %v1103_v30 }
 0x368   : > { %1313 = vst [vmem:[%s272_s14 + $0x8] sm:$0xff] %v1311_v29 }
 0x369   : > { %1948 = shalt.err (!%p1945_p7)
}
 0x36a   : > { %s1949_s13 = scalar_lea.hbm %s2304_s26, 256  ;;  %s1953_s9 = scalar_lea.hbm %s2352_s5, 768 }
 0x36b   : > { %p1950_p9 = scmp.ne.s32.totalorder %s2304_s26, %s1949_s13  ;;  %p1954_p5 = scmp.lt.u32.totalorder %s2304_s26, %s2352_s5 }
 0x36c   : > { %p1955_p10 = scmp.lt.u32.totalorder %s1953_s9, %s1949_s13  ;;  %p1957_p1 = scmp.lt.u32.totalorder %s1949_s13, %s2304_s26 }
 0x36d   : > { %p1951_p12 = pnand %p1950_p9, %p2168_p6 }
 0x36e   : > { %p1956_p11 = por %p1955_p10, %p1954_p5 }
 0x36f   : > { %p1952_p0 = pneg %p1951_p12 }
 0x370   : > { %p1958_p2 = por %p1957_p1, %p1956_p11 }
 0x372   : > { %p1959_p4 = pnand %p1958_p2, %p1952_p0 }
 0x374   : > { %1962 = shalt.err (!%p1959_p4)
}
 0x375   : > { %s2021_s7 = smov 128   ;;  %s2022_s6 = smov 8  }
 0x376   : > { %1649 = dma.vmem_to_hbm [thread:$0]  (%p2168_p6), %s2298_s15, 256, %s2304_s26, %s1315_s23, %s2021_s7, %s2021_s7, %s2022_s6  }
 0x377 PF: > { %p1671_p8 = scmp.ge.s32.totalorder %s2005_s21, 2  ;;  %s1343_s24 = sand.u32 1, %s1993_s18  }
 0x378   : > { %p2367_p13 = scmp.ne.s32.totalorder %s2357_s25, 0  ;;  %s1344_s10 = scalar_lea.sflag [#allocation4], %s1343_s24 }
 0x37a   : > { %p1663_p3 = pnand %p1671_p8, %p2367_p13 }
 0x37c   : > { %1988 = dma.done.wait (!%p1663_p3), %s1344_s10, 256  }
 0x37d   : > { %1990 = vsyncadd (!%p1663_p3), %s1344_s10, 4294967040  ;;  %p19_p7 = scmp.ge.s32.totalorder %s2155_s16, 5   ;;  %s2368_s18 = smov %s1997_s19 }
 0x37e   : > { %s2369_s19 = smov %s2001_s20  ;;  %s2370_s20 = smov %s2164_s27 }
 0x37f   : > { %s2371_s21 = smov %s2155_s16  ;;  %21 = sbr.rel (!%p19_p7) target bundleno = 6 (0x6), region = 93 }
 0x386   :  { %1349 = vsyncpa [#allocation3], 1 }
 0x387   :  { %1351 = vsyncpa [#allocation3 + $0x1], 1 }
 0x388   :  { %1352 = vsyncpa [#allocation6], 1 }
 0x389   :  { %1353 = vsyncpa [#allocation4], 1 }
 0x38a   :  { %1355 = vsyncpa [#allocation4 + $0x1], 1 }

</bundles_post_ra>
